<compile_context>
chip_gen: v7x
topology: tpu7x:2x2x1
jax: 0.10.0
libtpu: 0.0.40
codegen_flags: <defaults>
</compile_context>

<pallas_src>
import functools

import jax
import jax.numpy as jnp
from jax.experimental import pallas as pl
from jax.experimental.pallas import tpu as pltpu

HEADS = 9          # selfattention default heads=9 (classify never overrides it)
LN_EPS = 1e-5      # PyTorch nn.LayerNorm default eps


def _layernorm(v, g, b):
    mu = jnp.mean(v, axis=-1, keepdims=True)
    var = jnp.mean((v - mu) ** 2, axis=-1, keepdims=True)   # biased var (torch)
    return (v - mu) * jax.lax.rsqrt(var + LN_EPS) * g + b


def _softmax_last(s, approx=False):
    m = jnp.max(s, axis=-1, keepdims=True)
    e = jnp.exp(s - m)
    denom = jnp.sum(e, axis=-1, keepdims=True)
    if approx:
        return e * pl.reciprocal(denom, approx=True)
    return e / denom


# ---------------------------------------------------------------------------
# Fused forward kernel: grid axis = depth.  Activation (B*T, K) stays resident
# in VMEM scratch; classifier head runs on the last depth iteration.
# Dropout(p=0.5) layers are treated as identity (eval-mode semantics).
# No attention scaling (matches the reference code, which applies none).
# ---------------------------------------------------------------------------
def fused_forward_kernel(x_ref, wq_ref, wk_ref, wv_ref, wu_ref,
                         g1_ref, b1_ref, g2_ref, b2_ref,
                         w1_ref, bias1_ref, w2_ref, bias2_ref,
                         wp_ref, bp_ref, y1h_ref,
                         probs_ref, loss_ref, act_ref,
                         *, heads, batch, seqlen):
    d = pl.program_id(0)
    BT, K = act_ref.shape

    @pl.when(d == 0)
    def _init():
        act_ref[...] = x_ref[...]

    x = act_ref[...]                                     # (B*T, K) f32

    # ---- multi-head self-attention, all heads batched (no Python loops) ----
    wq = wq_ref[0]                                       # (H, K, K)
    wk = wk_ref[0]
    wv = wv_ref[0]
    wu = wu_ref[0]
    xh = jnp.broadcast_to(x[None], (heads, BT, K))       # (H, B*T, K)
    q = jnp.einsum('hnk,hkj->hnj', xh, wq, preferred_element_type=jnp.float32)
    kk = jnp.einsum('hnk,hkj->hnj', xh, wk, preferred_element_type=jnp.float32)
    v = jnp.einsum('hnk,hkj->hnj', xh, wv, preferred_element_type=jnp.float32)

    # (H, B*T, K) -> (H*B, T, K): fold head+batch into one batch dim (benign
    # reshapes only: split/merge of major / second-minor dims, lanes untouched)
    hb = heads * batch
    q3 = q.reshape(hb, seqlen, K)
    k3 = kk.reshape(hb, seqlen, K)
    v3 = v.reshape(hb, seqlen, K)

    scores = jnp.einsum('nqk,npk->nqp', q3, k3, preferred_element_type=jnp.float32)
    attn = _softmax_last(scores, approx=True)            # softmax over keys
    ctx = jnp.einsum('nqp,npk->nqk', attn, v3, preferred_element_type=jnp.float32)

    # "unified" Linear(h*k, k) == sum over heads of ctx_h @ Wu_h
    ctx_h = ctx.reshape(heads, BT, K)                    # (H, B*T, K)
    uni = jnp.sum(
        jnp.einsum('hnk,hkj->hnj', ctx_h, wu, preferred_element_type=jnp.float32),
        axis=0)                                          # (B*T, K)

    # ---- residual + LayerNorm 1 ----
    g1 = g1_ref[0]; b1 = b1_ref[0]; g2 = g2_ref[0]; b2 = b2_ref[0]
    x1 = _layernorm(uni + x, g1, b1)

    # ---- feed-forward (k -> 5k -> k, ReLU) ----
    h1 = jnp.dot(x1, w1_ref[0], preferred_element_type=jnp.float32) + bias1_ref[0]
    h1 = jnp.maximum(h1, 0.0)
    ff = jnp.dot(h1, w2_ref[0], preferred_element_type=jnp.float32) + bias2_ref[0]

    # ---- residual + LayerNorm 2 ----
    x2 = _layernorm(ff + x1, g2, b2)
    act_ref[...] = x2

    # ---- classifier head on the last block (fused, no extra launch) ----
    @pl.when(d == pl.num_programs(0) - 1)
    def _head():
        xb = x2.reshape(batch, seqlen, K)
        pooled = jnp.max(xb, axis=1)                     # max-pool over seq -> (B, K)
        logits = jnp.dot(pooled, wp_ref[...],
                         preferred_element_type=jnp.float32) + bp_ref[...]
        probs = _softmax_last(logits)                    # F.softmax(x, dim=1)
        probs_ref[...] = probs.astype(probs_ref.dtype)

        # CrossEntropyLoss(probs, y) = mean_i [ logsumexp(probs_i) - probs_i[y_i] ]
        pm = jnp.max(probs, axis=-1, keepdims=True)
        lse = jnp.log(jnp.sum(jnp.exp(probs - pm), axis=-1, keepdims=True)) + pm
        picked = jnp.sum(probs * y1h_ref[...], axis=-1, keepdims=True)
        loss_ref[...] = jnp.sum(lse - picked, axis=0, keepdims=True) / batch


def classify_forward(params, x_tok, y, num_classes):
    B, T = x_tok.shape
    K = params["tokenemb"].shape[1]
    depth = params["wq"].shape[0]
    C = num_classes
    K5 = 5 * K

    # Embedding gathers + one-hot labels are glue (data-dependent gather).
    tokens = jnp.take(params["tokenemb"], x_tok, axis=0)          # (B, T, K)
    pos = params["posemb"][:T][None, :, :]                        # (1, T, K)
    x2d = (tokens + pos).reshape(B * T, K).astype(jnp.float32)
    # TODO(synk): Dropout(p=0.5) layers implemented as identity (eval-mode semantics).
    y1h = jax.nn.one_hot(y, C, dtype=jnp.float32)

    kernel = functools.partial(fused_forward_kernel, heads=HEADS, batch=B, seqlen=T)

    blk4 = lambda shp: pl.BlockSpec(shp, lambda d: (d, 0, 0, 0))
    blk3 = lambda shp: pl.BlockSpec(shp, lambda d: (d, 0, 0))
    rep2 = lambda shp: pl.BlockSpec(shp, lambda d: (0, 0))

    in_specs = [
        rep2((B * T, K)),                        # x (loaded/used only at d==0)
        blk4((1, HEADS, K, K)),                  # wq
        blk4((1, HEADS, K, K)),                  # wk
        blk4((1, HEADS, K, K)),                  # wv
        blk4((1, HEADS, K, K)),                  # wu
        blk3((1, 1, K)),                         # g1
        blk3((1, 1, K)),                         # b1
        blk3((1, 1, K)),                         # g2
        blk3((1, 1, K)),                         # b2
        blk3((1, K, K5)),                        # w1
        blk3((1, 1, K5)),                        # bias1
        blk3((1, K5, K)),                        # w2
        blk3((1, 1, K)),                         # bias2
        rep2((K, C)),                            # wp
        rep2((1, C)),                            # bp
        rep2((B, C)),                            # y one-hot
    ]
    out_specs = (rep2((B, C)), rep2((1, 1)))

    probs, loss = pl.pallas_call(
        kernel,
        out_shape=(jax.ShapeDtypeStruct((B, C), jnp.float32),
                   jax.ShapeDtypeStruct((1, 1), jnp.float32)),
        grid=(depth,),
        in_specs=in_specs,
        out_specs=out_specs,
        scratch_shapes=[pltpu.VMEM((B * T, K), jnp.float32)],
        compiler_params=pltpu.CompilerParams(dimension_semantics=("arbitrary",)),
    )(x2d,
      params["wq"], params["wk"], params["wv"], params["wu"],
      params["g1"], params["b1"], params["g2"], params["b2"],
      params["w1"], params["bias1"], params["w2"], params["bias2"],
      params["wp"], params["bp"], y1h)
    return loss[0, 0], probs


# ---------------------------------------------------------------------------
# Parameter init (deterministic, synthetic): per-block weights stacked along a
# leading depth axis so the fused kernel can index them with the depth grid.
# ---------------------------------------------------------------------------
def init_params(key, k, seq_length, num_tokens, depth, num_classes, heads=HEADS):
    keys = jax.random.split(key, 9)
    scale = 0.02

    def nrm(kk, shape):
        return jax.random.normal(kk, shape, jnp.float32) * scale

    return {
        "tokenemb": nrm(keys[0], (num_tokens, k)),
        "posemb": nrm(keys[1], (seq_length, k)),
        # per-head projection weights, head-major split of the (k, h*k) linear
        "wq": nrm(keys[2], (depth, heads, k, k)),
        "wk": nrm(keys[3], (depth, heads, k, k)),
        "wv": nrm(keys[4], (depth, heads, k, k)),
        "wu": nrm(keys[5], (depth, heads, k, k)),
        "g1": jnp.ones((depth, 1, k), jnp.float32),
        "b1": jnp.zeros((depth, 1, k), jnp.float32),
        "g2": jnp.ones((depth, 1, k), jnp.float32),
        "b2": jnp.zeros((depth, 1, k), jnp.float32),
        "w1": nrm(keys[6], (depth, k, 5 * k)),
        "bias1": jnp.zeros((depth, 1, 5 * k), jnp.float32),
        "w2": nrm(keys[7], (depth, 5 * k, k)),
        "bias2": jnp.zeros((depth, 1, k), jnp.float32),
        "wp": nrm(keys[8], (k, num_classes)),
        "bp": jnp.zeros((1, num_classes), jnp.float32),
    }


if __name__ == "__main__":
    K = 32          # model dim
    T = 8           # seq length
    NUM_TOKENS = 50
    DEPTH = 2
    NUM_CLASSES = 4
    B = 2

    key = jax.random.PRNGKey(0)
    pkey, xkey, ykey = jax.random.split(key, 3)
    params = init_params(pkey, K, T, NUM_TOKENS, DEPTH, NUM_CLASSES)
    x_tok = jax.random.randint(xkey, (B, T), 0, NUM_TOKENS, dtype=jnp.int32)
    y = jax.random.randint(ykey, (B,), 0, NUM_CLASSES, dtype=jnp.int32)

    loss, probs = classify_forward(params, x_tok, y, NUM_CLASSES)
    jax.block_until_ready((loss, probs))
    assert probs.shape == (B, NUM_CLASSES) and loss.shape == ()
    assert bool(jnp.isfinite(loss)) and bool(jnp.all(jnp.isfinite(probs)))
    print("KERNEL_OK")
</pallas_src>

<mosaic_0001>
module attributes {stable_mosaic.version = 11 : i64} {
  func.func @fused_forward_kernel(%arg0: i32, %arg1: memref<16x32xf32, #tpu.memory_space<vmem>>, %arg2: memref<1x9x32x32xf32, #tpu.memory_space<vmem>>, %arg3: memref<1x9x32x32xf32, #tpu.memory_space<vmem>>, %arg4: memref<1x9x32x32xf32, #tpu.memory_space<vmem>>, %arg5: memref<1x9x32x32xf32, #tpu.memory_space<vmem>>, %arg6: memref<1x1x32xf32, #tpu.memory_space<vmem>>, %arg7: memref<1x1x32xf32, #tpu.memory_space<vmem>>, %arg8: memref<1x1x32xf32, #tpu.memory_space<vmem>>, %arg9: memref<1x1x32xf32, #tpu.memory_space<vmem>>, %arg10: memref<1x32x160xf32, #tpu.memory_space<vmem>>, %arg11: memref<1x1x160xf32, #tpu.memory_space<vmem>>, %arg12: memref<1x160x32xf32, #tpu.memory_space<vmem>>, %arg13: memref<1x1x32xf32, #tpu.memory_space<vmem>>, %arg14: memref<32x4xf32, #tpu.memory_space<vmem>>, %arg15: memref<1x4xf32, #tpu.memory_space<vmem>>, %arg16: memref<2x4xf32, #tpu.memory_space<vmem>>, %arg17: memref<2x4xf32, #tpu.memory_space<vmem>>, %arg18: memref<1x1xf32, #tpu.memory_space<vmem>>, %arg19: memref<16x32xf32, #tpu.memory_space<vmem>>) attributes {dimension_semantics = [#tpu.dimension_semantics<arbitrary>], iteration_bounds = array<i64: 2>, scalar_prefetch = 0 : i64, scratch_operands = 1 : i64, tpu.core_type = #tpu.core_type<tc>, window_params = [{pipeline_mode = #tpu.pipeline_mode<synchronous>, transform_indices = @transform_0, window_bounds = array<i64: 16, 32>}, {transform_indices = @transform_1, window_bounds = array<i64: 1, 9, 32, 32>}, {transform_indices = @transform_2, window_bounds = array<i64: 1, 9, 32, 32>}, {transform_indices = @transform_3, window_bounds = array<i64: 1, 9, 32, 32>}, {transform_indices = @transform_4, window_bounds = array<i64: 1, 9, 32, 32>}, {transform_indices = @transform_5, window_bounds = array<i64: 1, 1, 32>}, {transform_indices = @transform_6, window_bounds = array<i64: 1, 1, 32>}, {transform_indices = @transform_7, window_bounds = array<i64: 1, 1, 32>}, {transform_indices = @transform_8, window_bounds = array<i64: 1, 1, 32>}, {transform_indices = @transform_9, window_bounds = array<i64: 1, 32, 160>}, {transform_indices = @transform_10, window_bounds = array<i64: 1, 1, 160>}, {transform_indices = @transform_11, window_bounds = array<i64: 1, 160, 32>}, {transform_indices = @transform_12, window_bounds = array<i64: 1, 1, 32>}, {pipeline_mode = #tpu.pipeline_mode<synchronous>, transform_indices = @transform_13, window_bounds = array<i64: 32, 4>}, {pipeline_mode = #tpu.pipeline_mode<synchronous>, transform_indices = @transform_14, window_bounds = array<i64: 1, 4>}, {pipeline_mode = #tpu.pipeline_mode<synchronous>, transform_indices = @transform_15, window_bounds = array<i64: 2, 4>}, {pipeline_mode = #tpu.pipeline_mode<synchronous>, transform_indices = @transform_16, window_bounds = array<i64: 2, 4>}, {pipeline_mode = #tpu.pipeline_mode<synchronous>, transform_indices = @transform_17, window_bounds = array<i64: 1, 1>}]} {
    %c0_i32 = arith.constant 0 : i32
    %0 = arith.cmpi eq, %arg0, %c0_i32 : i32
    %1 = arith.extui %0 : i1 to i32
    %c0_i32_0 = arith.constant 0 : i32
    %2 = arith.cmpi ne, %1, %c0_i32_0 : i32
    scf.if %2 {
      %c0_66 = arith.constant 0 : index
      %c0_67 = arith.constant 0 : index
      %110 = vector.load %arg1[%c0_66, %c0_67] : memref<16x32xf32, #tpu.memory_space<vmem>>, vector<16x32xf32>
      %c0_68 = arith.constant 0 : index
      %c0_69 = arith.constant 0 : index
      %111 = vector.load %arg19[%c0_68, %c0_69] : memref<16x32xf32, #tpu.memory_space<vmem>>, vector<16x32xf32>
      tpu.vector_store %arg19[%c0_68, %c0_69], %110 {strides = array<i32>} : memref<16x32xf32, #tpu.memory_space<vmem>>, vector<16x32xf32>,
    } else {
    }
    %c0 = arith.constant 0 : index
    %c0_1 = arith.constant 0 : index
    %3 = vector.load %arg19[%c0, %c0_1] : memref<16x32xf32, #tpu.memory_space<vmem>>, vector<16x32xf32>
    %c0_2 = arith.constant 0 : index
    %c0_3 = arith.constant 0 : index
    %c0_4 = arith.constant 0 : index
    %c0_5 = arith.constant 0 : index
    %4 = vector.load %arg2[%c0_2, %c0_3, %c0_4, %c0_5] : memref<1x9x32x32xf32, #tpu.memory_space<vmem>>, vector<1x9x32x32xf32>
    %5 = vector.shape_cast %4 : vector<1x9x32x32xf32> to vector<9x32x32xf32>
    %c0_6 = arith.constant 0 : index
    %c0_7 = arith.constant 0 : index
    %c0_8 = arith.constant 0 : index
    %c0_9 = arith.constant 0 : index
    %6 = vector.load %arg3[%c0_6, %c0_7, %c0_8, %c0_9] : memref<1x9x32x32xf32, #tpu.memory_space<vmem>>, vector<1x9x32x32xf32>
    %7 = vector.shape_cast %6 : vector<1x9x32x32xf32> to vector<9x32x32xf32>
    %c0_10 = arith.constant 0 : index
    %c0_11 = arith.constant 0 : index
    %c0_12 = arith.constant 0 : index
    %c0_13 = arith.constant 0 : index
    %8 = vector.load %arg4[%c0_10, %c0_11, %c0_12, %c0_13] : memref<1x9x32x32xf32, #tpu.memory_space<vmem>>, vector<1x9x32x32xf32>
    %9 = vector.shape_cast %8 : vector<1x9x32x32xf32> to vector<9x32x32xf32>
    %c0_14 = arith.constant 0 : index
    %c0_15 = arith.constant 0 : index
    %c0_16 = arith.constant 0 : index
    %c0_17 = arith.constant 0 : index
    %10 = vector.load %arg5[%c0_14, %c0_15, %c0_16, %c0_17] : memref<1x9x32x32xf32, #tpu.memory_space<vmem>>, vector<1x9x32x32xf32>
    %11 = vector.shape_cast %10 : vector<1x9x32x32xf32> to vector<9x32x32xf32>
    %12 = vector.shape_cast %3 : vector<16x32xf32> to vector<1x16x32xf32>
    %13 = vector.shape_cast %12 : vector<1x16x32xf32> to vector<1x16x32xf32>
    %14 = vector.broadcast %13 : vector<1x16x32xf32> to vector<9x16x32xf32>
    "tpu.trace_start"() <{level = 10 : i32, message = "hnk,hkj->hnj"}> : () -> ()
    %cst = arith.constant dense<0.000000e+00> : vector<9x16x32xf32>
    %15 = tpu.matmul %14, %5, %cst {dimension_numbers = #tpu.dot_dimension_numbers<[2], [1], [1], [2], [0, 0, 0, 1, 1, 2], [0], [0]>} : vector<9x16x32xf32>, vector<9x32x32xf32>, vector<9x16x32xf32> -> vector<9x16x32xf32>
    %cst_18 = arith.constant dense<0.000000e+00> : vector<9x16x32xf32>
    %16 = tpu.matmul %14, %7, %cst_18 {dimension_numbers = #tpu.dot_dimension_numbers<[2], [1], [1], [2], [0, 0, 0, 1, 1, 2], [0], [0]>} : vector<9x16x32xf32>, vector<9x32x32xf32>, vector<9x16x32xf32> -> vector<9x16x32xf32>
    %cst_19 = arith.constant dense<0.000000e+00> : vector<9x16x32xf32>
    %17 = tpu.matmul %14, %9, %cst_19 {dimension_numbers = #tpu.dot_dimension_numbers<[2], [1], [1], [2], [0, 0, 0, 1, 1, 2], [0], [0]>} : vector<9x16x32xf32>, vector<9x32x32xf32>, vector<9x16x32xf32> -> vector<9x16x32xf32>
    "tpu.trace_stop"() : () -> ()
    %18 = vector.shape_cast %15 : vector<9x16x32xf32> to vector<18x8x32xf32>
    %19 = vector.shape_cast %16 : vector<9x16x32xf32> to vector<18x8x32xf32>
    %20 = vector.shape_cast %17 : vector<9x16x32xf32> to vector<18x8x32xf32>
    "tpu.trace_start"() <{level = 10 : i32, message = "nqk,npk->nqp"}> : () -> ()
    %cst_20 = arith.constant dense<0.000000e+00> : vector<18x8x8xf32>
    %21 = tpu.matmul %18, %19, %cst_20 {dimension_numbers = #tpu.dot_dimension_numbers<[2], [2], [1], [1], [0, 0, 0, 1, 1, 1], [0], [0]>} : vector<18x8x32xf32>, vector<18x8x32xf32>, vector<18x8x8xf32> -> vector<18x8x8xf32>
    "tpu.trace_stop"() : () -> ()
    %cst_21 = arith.constant dense<0xFF800000> : vector<18x8xf32>
    %22 = vector.multi_reduction <maximumf>, %21, %cst_21 [2] : vector<18x8x8xf32> to vector<18x8xf32>
    %23 = vector.shape_cast %22 : vector<18x8xf32> to vector<18x8x1xf32>
    %24 = vector.broadcast %23 : vector<18x8x1xf32> to vector<18x8x8xf32>
    %25 = arith.subf %21, %24 : vector<18x8x8xf32>
    %26 = math.exp %25 : vector<18x8x8xf32>
    %cst_22 = arith.constant dense<0.000000e+00> : vector<18x8xf32>
    %27 = vector.multi_reduction <add>, %26, %cst_22 [2] : vector<18x8x8xf32> to vector<18x8xf32>
    %28 = vector.shape_cast %27 : vector<18x8xf32> to vector<18x8x1xf32>
    %29 = tpu.reciprocal %28 {approx = true} : vector<18x8x1xf32> -> vector<18x8x1xf32>
    %30 = vector.broadcast %29 : vector<18x8x1xf32> to vector<18x8x8xf32>
    %31 = arith.mulf %26, %30 : vector<18x8x8xf32>
    "tpu.trace_start"() <{level = 10 : i32, message = "nqp,npk->nqk"}> : () -> ()
    %cst_23 = arith.constant dense<0.000000e+00> : vector<18x8x32xf32>
    %32 = tpu.matmul %31, %20, %cst_23 {dimension_numbers = #tpu.dot_dimension_numbers<[2], [1], [1], [2], [0, 0, 0, 1, 1, 2], [0], [0]>} : vector<18x8x8xf32>, vector<18x8x32xf32>, vector<18x8x32xf32> -> vector<18x8x32xf32>
    "tpu.trace_stop"() : () -> ()
    %33 = vector.shape_cast %32 : vector<18x8x32xf32> to vector<9x16x32xf32>
    "tpu.trace_start"() <{level = 10 : i32, message = "hnk,hkj->hnj"}> : () -> ()
    %cst_24 = arith.constant dense<0.000000e+00> : vector<9x16x32xf32>
    %34 = tpu.matmul %33, %11, %cst_24 {dimension_numbers = #tpu.dot_dimension_numbers<[2], [1], [1], [2], [0, 0, 0, 1, 1, 2], [0], [0]>} : vector<9x16x32xf32>, vector<9x32x32xf32>, vector<9x16x32xf32> -> vector<9x16x32xf32>
    "tpu.trace_stop"() : () -> ()
    %cst_25 = arith.constant dense<0.000000e+00> : vector<16x32xf32>
    %35 = vector.multi_reduction <add>, %34, %cst_25 [0] : vector<9x16x32xf32> to vector<16x32xf32>
    %c0_26 = arith.constant 0 : index
    %c0_27 = arith.constant 0 : index
    %c0_28 = arith.constant 0 : index
    %36 = vector.load %arg6[%c0_26, %c0_27, %c0_28] : memref<1x1x32xf32, #tpu.memory_space<vmem>>, vector<1x1x32xf32>
    %37 = vector.shape_cast %36 : vector<1x1x32xf32> to vector<1x32xf32>
    %c0_29 = arith.constant 0 : index
    %c0_30 = arith.constant 0 : index
    %c0_31 = arith.constant 0 : index
    %38 = vector.load %arg7[%c0_29, %c0_30, %c0_31] : memref<1x1x32xf32, #tpu.memory_space<vmem>>, vector<1x1x32xf32>
    %39 = vector.shape_cast %38 : vector<1x1x32xf32> to vector<1x32xf32>
    %c0_32 = arith.constant 0 : index
    %c0_33 = arith.constant 0 : index
    %c0_34 = arith.constant 0 : index
    %40 = vector.load %arg8[%c0_32, %c0_33, %c0_34] : memref<1x1x32xf32, #tpu.memory_space<vmem>>, vector<1x1x32xf32>
    %41 = vector.shape_cast %40 : vector<1x1x32xf32> to vector<1x32xf32>
    %c0_35 = arith.constant 0 : index
    %c0_36 = arith.constant 0 : index
    %c0_37 = arith.constant 0 : index
    %42 = vector.load %arg9[%c0_35, %c0_36, %c0_37] : memref<1x1x32xf32, #tpu.memory_space<vmem>>, vector<1x1x32xf32>
    %43 = vector.shape_cast %42 : vector<1x1x32xf32> to vector<1x32xf32>
    %44 = arith.addf %35, %3 : vector<16x32xf32>
    %cst_38 = arith.constant dense<0.000000e+00> : vector<16xf32>
    %45 = vector.multi_reduction <add>, %44, %cst_38 [1] : vector<16x32xf32> to vector<16xf32>
    %46 = vector.shape_cast %45 : vector<16xf32> to vector<16x1xf32>
    %cst_39 = arith.constant 3.200000e+01 : f32
    %47 = vector.broadcast %cst_39 : f32 to vector<16x1xf32>
    %48 = arith.divf %46, %47 : vector<16x1xf32>
    %49 = vector.broadcast %48 : vector<16x1xf32> to vector<16x32xf32>
    %50 = arith.subf %44, %49 : vector<16x32xf32>
    %51 = arith.mulf %50, %50 : vector<16x32xf32>
    %cst_40 = arith.constant dense<0.000000e+00> : vector<16xf32>
    %52 = vector.multi_reduction <add>, %51, %cst_40 [1] : vector<16x32xf32> to vector<16xf32>
    %53 = vector.shape_cast %52 : vector<16xf32> to vector<16x1xf32>
    %cst_41 = arith.constant 3.200000e+01 : f32
    %54 = vector.broadcast %cst_41 : f32 to vector<16x1xf32>
    %55 = arith.divf %53, %54 : vector<16x1xf32>
    %56 = vector.broadcast %48 : vector<16x1xf32> to vector<16x32xf32>
    %57 = arith.subf %44, %56 : vector<16x32xf32>
    %cst_42 = arith.constant 9.99999974E-6 : f32
    %58 = vector.broadcast %cst_42 : f32 to vector<16x1xf32>
    %59 = arith.addf %55, %58 : vector<16x1xf32>
    %60 = math.rsqrt %59 : vector<16x1xf32>
    %61 = vector.broadcast %60 : vector<16x1xf32> to vector<16x32xf32>
    %62 = arith.mulf %57, %61 : vector<16x32xf32>
    %63 = vector.broadcast %37 : vector<1x32xf32> to vector<16x32xf32>
    %64 = arith.mulf %62, %63 : vector<16x32xf32>
    %65 = vector.broadcast %39 : vector<1x32xf32> to vector<16x32xf32>
    %66 = arith.addf %64, %65 : vector<16x32xf32>
    %c0_43 = arith.constant 0 : index
    %c0_44 = arith.constant 0 : index
    %c0_45 = arith.constant 0 : index
    %67 = vector.load %arg10[%c0_43, %c0_44, %c0_45] : memref<1x32x160xf32, #tpu.memory_space<vmem>>, vector<1x32x160xf32>
    %68 = vector.shape_cast %67 : vector<1x32x160xf32> to vector<32x160xf32>
    %cst_46 = arith.constant dense<0.000000e+00> : vector<16x160xf32>
    %69 = tpu.matmul %66, %68, %cst_46 {dimension_numbers = #tpu.dot_dimension_numbers<[1], [0], [0], [1], [0, 0, 1, 1], [], []>} : vector<16x32xf32>, vector<32x160xf32>, vector<16x160xf32> -> vector<16x160xf32>
    %c0_47 = arith.constant 0 : index
    %c0_48 = arith.constant 0 : index
    %c0_49 = arith.constant 0 : index
    %70 = vector.load %arg11[%c0_47, %c0_48, %c0_49] : memref<1x1x160xf32, #tpu.memory_space<vmem>>, vector<1x1x160xf32>
    %71 = vector.shape_cast %70 : vector<1x1x160xf32> to vector<1x160xf32>
    %72 = vector.broadcast %71 : vector<1x160xf32> to vector<16x160xf32>
    %73 = arith.addf %69, %72 : vector<16x160xf32>
    %cst_50 = arith.constant 0.000000e+00 : f32
    %74 = vector.broadcast %cst_50 : f32 to vector<16x160xf32>
    %75 = arith.maximumf %73, %74 : vector<16x160xf32>
    %c0_51 = arith.constant 0 : index
    %c0_52 = arith.constant 0 : index
    %c0_53 = arith.constant 0 : index
    %76 = vector.load %arg12[%c0_51, %c0_52, %c0_53] : memref<1x160x32xf32, #tpu.memory_space<vmem>>, vector<1x160x32xf32>
    %77 = vector.shape_cast %76 : vector<1x160x32xf32> to vector<160x32xf32>
    %cst_54 = arith.constant dense<0.000000e+00> : vector<16x32xf32>
    %78 = tpu.matmul %75, %77, %cst_54 {dimension_numbers = #tpu.dot_dimension_numbers<[1], [0], [0], [1], [0, 0, 1, 1], [], []>} : vector<16x160xf32>, vector<160x32xf32>, vector<16x32xf32> -> vector<16x32xf32>
    %c0_55 = arith.constant 0 : index
    %c0_56 = arith.constant 0 : index
    %c0_57 = arith.constant 0 : index
    %79 = vector.load %arg13[%c0_55, %c0_56, %c0_57] : memref<1x1x32xf32, #tpu.memory_space<vmem>>, vector<1x1x32xf32>
    %80 = vector.shape_cast %79 : vector<1x1x32xf32> to vector<1x32xf32>
    %81 = vector.broadcast %80 : vector<1x32xf32> to vector<16x32xf32>
    %82 = arith.addf %78, %81 : vector<16x32xf32>
    %83 = arith.addf %82, %66 : vector<16x32xf32>
    %cst_58 = arith.constant dense<0.000000e+00> : vector<16xf32>
    %84 = vector.multi_reduction <add>, %83, %cst_58 [1] : vector<16x32xf32> to vector<16xf32>
    %85 = vector.shape_cast %84 : vector<16xf32> to vector<16x1xf32>
    %cst_59 = arith.constant 3.200000e+01 : f32
    %86 = vector.broadcast %cst_59 : f32 to vector<16x1xf32>
    %87 = arith.divf %85, %86 : vector<16x1xf32>
    %88 = vector.broadcast %87 : vector<16x1xf32> to vector<16x32xf32>
    %89 = arith.subf %83, %88 : vector<16x32xf32>
    %90 = arith.mulf %89, %89 : vector<16x32xf32>
    %cst_60 = arith.constant dense<0.000000e+00> : vector<16xf32>
    %91 = vector.multi_reduction <add>, %90, %cst_60 [1] : vector<16x32xf32> to vector<16xf32>
    %92 = vector.shape_cast %91 : vector<16xf32> to vector<16x1xf32>
    %cst_61 = arith.constant 3.200000e+01 : f32
    %93 = vector.broadcast %cst_61 : f32 to vector<16x1xf32>
    %94 = arith.divf %92, %93 : vector<16x1xf32>
    %95 = vector.broadcast %87 : vector<16x1xf32> to vector<16x32xf32>
    %96 = arith.subf %83, %95 : vector<16x32xf32>
    %cst_62 = arith.constant 9.99999974E-6 : f32
    %97 = vector.broadcast %cst_62 : f32 to vector<16x1xf32>
    %98 = arith.addf %94, %97 : vector<16x1xf32>
    %99 = math.rsqrt %98 : vector<16x1xf32>
    %100 = vector.broadcast %99 : vector<16x1xf32> to vector<16x32xf32>
    %101 = arith.mulf %96, %100 : vector<16x32xf32>
    %102 = vector.broadcast %41 : vector<1x32xf32> to vector<16x32xf32>
    %103 = arith.mulf %101, %102 : vector<16x32xf32>
    %104 = vector.broadcast %43 : vector<1x32xf32> to vector<16x32xf32>
    %105 = arith.addf %103, %104 : vector<16x32xf32>
    %c0_63 = arith.constant 0 : index
    %c0_64 = arith.constant 0 : index
    %106 = vector.load %arg19[%c0_63, %c0_64] : memref<16x32xf32, #tpu.memory_space<vmem>>, vector<16x32xf32>
    tpu.vector_store %arg19[%c0_63, %c0_64], %105 {strides = array<i32>} : memref<16x32xf32, #tpu.memory_space<vmem>>, vector<16x32xf32>,
    %c1_i32 = arith.constant 1 : i32
    %107 = arith.cmpi eq, %arg0, %c1_i32 : i32
    %108 = arith.extui %107 : i1 to i32
    %c0_i32_65 = arith.constant 0 : i32
    %109 = arith.cmpi ne, %108, %c0_i32_65 : i32
    scf.if %109 {
      %110 = vector.shape_cast %105 : vector<16x32xf32> to vector<2x8x32xf32>
      %cst_66 = arith.constant dense<0xFF800000> : vector<2x32xf32>
      %111 = vector.multi_reduction <maximumf>, %110, %cst_66 [1] : vector<2x8x32xf32> to vector<2x32xf32>
      %c0_67 = arith.constant 0 : index
      %c0_68 = arith.constant 0 : index
      %112 = vector.load %arg14[%c0_67, %c0_68] : memref<32x4xf32, #tpu.memory_space<vmem>>, vector<32x4xf32>
      %cst_69 = arith.constant dense<0.000000e+00> : vector<2x4xf32>
      %113 = tpu.matmul %111, %112, %cst_69 {dimension_numbers = #tpu.dot_dimension_numbers<[1], [0], [0], [1], [0, 0, 1, 1], [], []>} : vector<2x32xf32>, vector<32x4xf32>, vector<2x4xf32> -> vector<2x4xf32>
      %c0_70 = arith.constant 0 : index
      %c0_71 = arith.constant 0 : index
      %114 = vector.load %arg15[%c0_70, %c0_71] : memref<1x4xf32, #tpu.memory_space<vmem>>, vector<1x4xf32>
      %115 = vector.broadcast %114 : vector<1x4xf32> to vector<2x4xf32>
      %116 = arith.addf %113, %115 : vector<2x4xf32>
      %cst_72 = arith.constant dense<0xFF800000> : vector<2xf32>
      %117 = vector.multi_reduction <maximumf>, %116, %cst_72 [1] : vector<2x4xf32> to vector<2xf32>
      %118 = vector.shape_cast %117 : vector<2xf32> to vector<2x1xf32>
      %119 = vector.broadcast %118 : vector<2x1xf32> to vector<2x4xf32>
      %120 = arith.subf %116, %119 : vector<2x4xf32>
      %121 = math.exp %120 : vector<2x4xf32>
      %cst_73 = arith.constant dense<0.000000e+00> : vector<2xf32>
      %122 = vector.multi_reduction <add>, %121, %cst_73 [1] : vector<2x4xf32> to vector<2xf32>
      %123 = vector.shape_cast %122 : vector<2xf32> to vector<2x1xf32>
      %124 = vector.broadcast %123 : vector<2x1xf32> to vector<2x4xf32>
      %125 = arith.divf %121, %124 : vector<2x4xf32>
      %c0_74 = arith.constant 0 : index
      %c0_75 = arith.constant 0 : index
      %126 = vector.load %arg17[%c0_74, %c0_75] : memref<2x4xf32, #tpu.memory_space<vmem>>, vector<2x4xf32>
      tpu.vector_store %arg17[%c0_74, %c0_75], %125 {strides = array<i32>} : memref<2x4xf32, #tpu.memory_space<vmem>>, vector<2x4xf32>,
      %cst_76 = arith.constant dense<0xFF800000> : vector<2xf32>
      %127 = vector.multi_reduction <maximumf>, %125, %cst_76 [1] : vector<2x4xf32> to vector<2xf32>
      %128 = vector.shape_cast %127 : vector<2xf32> to vector<2x1xf32>
      %129 = vector.broadcast %128 : vector<2x1xf32> to vector<2x4xf32>
      %130 = arith.subf %125, %129 : vector<2x4xf32>
      %131 = math.exp %130 : vector<2x4xf32>
      %cst_77 = arith.constant dense<0.000000e+00> : vector<2xf32>
      %132 = vector.multi_reduction <add>, %131, %cst_77 [1] : vector<2x4xf32> to vector<2xf32>
      %133 = vector.shape_cast %132 : vector<2xf32> to vector<2x1xf32>
      %134 = math.log %133 : vector<2x1xf32>
      %135 = arith.addf %134, %128 : vector<2x1xf32>
      %c0_78 = arith.constant 0 : index
      %c0_79 = arith.constant 0 : index
      %136 = vector.load %arg16[%c0_78, %c0_79] : memref<2x4xf32, #tpu.memory_space<vmem>>, vector<2x4xf32>
      %137 = arith.mulf %125, %136 : vector<2x4xf32>
      %cst_80 = arith.constant dense<0.000000e+00> : vector<2xf32>
      %138 = vector.multi_reduction <add>, %137, %cst_80 [1] : vector<2x4xf32> to vector<2xf32>
      %139 = vector.shape_cast %138 : vector<2xf32> to vector<2x1xf32>
      %140 = arith.subf %135, %139 : vector<2x1xf32>
      %cst_81 = arith.constant dense<0.000000e+00> : vector<1xf32>
      %141 = vector.multi_reduction <add>, %140, %cst_81 [0] : vector<2x1xf32> to vector<1xf32>
      %142 = vector.shape_cast %141 : vector<1xf32> to vector<1x1xf32>
      %cst_82 = arith.constant 2.000000e+00 : f32
      %143 = vector.broadcast %cst_82 : f32 to vector<1x1xf32>
      %144 = arith.divf %142, %143 : vector<1x1xf32>
      %c0_83 = arith.constant 0 : index
      %c0_84 = arith.constant 0 : index
      %145 = vector.load %arg18[%c0_83, %c0_84] : memref<1x1xf32, #tpu.memory_space<vmem>>, vector<1x1xf32>
      tpu.vector_store %arg18[%c0_83, %c0_84], %144 {strides = array<i32>} : memref<1x1xf32, #tpu.memory_space<vmem>>, vector<1x1xf32>,
    } else {
    }
    return
  }
  func.func @transform_0(%arg0: i32) -> (i32, i32) {
    %c0_i32 = arith.constant 0 : i32
    %c0_i32_0 = arith.constant 0 : i32
    %c0_i32_1 = arith.constant 0 : i32
    return %c0_i32, %c0_i32_0 : i32, i32
  }
  func.func @transform_1(%arg0: i32) -> (i32, i32, i32, i32) {
    %c0_i32 = arith.constant 0 : i32
    %c0_i32_0 = arith.constant 0 : i32
    %c0_i32_1 = arith.constant 0 : i32
    %c0_i32_2 = arith.constant 0 : i32
    return %arg0, %c0_i32, %c0_i32_0, %c0_i32_1 : i32, i32, i32, i32
  }
  func.func @transform_2(%arg0: i32) -> (i32, i32, i32, i32) {
    %c0_i32 = arith.constant 0 : i32
    %c0_i32_0 = arith.constant 0 : i32
    %c0_i32_1 = arith.constant 0 : i32
    %c0_i32_2 = arith.constant 0 : i32
    return %arg0, %c0_i32, %c0_i32_0, %c0_i32_1 : i32, i32, i32, i32
  }
  func.func @transform_3(%arg0: i32) -> (i32, i32, i32, i32) {
    %c0_i32 = arith.constant 0 : i32
    %c0_i32_0 = arith.constant 0 : i32
    %c0_i32_1 = arith.constant 0 : i32
    %c0_i32_2 = arith.constant 0 : i32
    return %arg0, %c0_i32, %c0_i32_0, %c0_i32_1 : i32, i32, i32, i32
  }
  func.func @transform_4(%arg0: i32) -> (i32, i32, i32, i32) {
    %c0_i32 = arith.constant 0 : i32
    %c0_i32_0 = arith.constant 0 : i32
    %c0_i32_1 = arith.constant 0 : i32
    %c0_i32_2 = arith.constant 0 : i32
    return %arg0, %c0_i32, %c0_i32_0, %c0_i32_1 : i32, i32, i32, i32
  }
  func.func @transform_5(%arg0: i32) -> (i32, i32, i32) {
    %c0_i32 = arith.constant 0 : i32
    %c0_i32_0 = arith.constant 0 : i32
    %c0_i32_1 = arith.constant 0 : i32
    return %arg0, %c0_i32, %c0_i32_0 : i32, i32, i32
  }
  func.func @transform_6(%arg0: i32) -> (i32, i32, i32) {
    %c0_i32 = arith.constant 0 : i32
    %c0_i32_0 = arith.constant 0 : i32
    %c0_i32_1 = arith.constant 0 : i32
    return %arg0, %c0_i32, %c0_i32_0 : i32, i32, i32
  }
  func.func @transform_7(%arg0: i32) -> (i32, i32, i32) {
    %c0_i32 = arith.constant 0 : i32
    %c0_i32_0 = arith.constant 0 : i32
    %c0_i32_1 = arith.constant 0 : i32
    return %arg0, %c0_i32, %c0_i32_0 : i32, i32, i32
  }
  func.func @transform_8(%arg0: i32) -> (i32, i32, i32) {
    %c0_i32 = arith.constant 0 : i32
    %c0_i32_0 = arith.constant 0 : i32
    %c0_i32_1 = arith.constant 0 : i32
    return %arg0, %c0_i32, %c0_i32_0 : i32, i32, i32
  }
  func.func @transform_9(%arg0: i32) -> (i32, i32, i32) {
    %c0_i32 = arith.constant 0 : i32
    %c0_i32_0 = arith.constant 0 : i32
    %c0_i32_1 = arith.constant 0 : i32
    return %arg0, %c0_i32, %c0_i32_0 : i32, i32, i32
  }
  func.func @transform_10(%arg0: i32) -> (i32, i32, i32) {
    %c0_i32 = arith.constant 0 : i32
    %c0_i32_0 = arith.constant 0 : i32
    %c0_i32_1 = arith.constant 0 : i32
    return %arg0, %c0_i32, %c0_i32_0 : i32, i32, i32
  }
  func.func @transform_11(%arg0: i32) -> (i32, i32, i32) {
    %c0_i32 = arith.constant 0 : i32
    %c0_i32_0 = arith.constant 0 : i32
    %c0_i32_1 = arith.constant 0 : i32
    return %arg0, %c0_i32, %c0_i32_0 : i32, i32, i32
  }
  func.func @transform_12(%arg0: i32) -> (i32, i32, i32) {
    %c0_i32 = arith.constant 0 : i32
    %c0_i32_0 = arith.constant 0 : i32
    %c0_i32_1 = arith.constant 0 : i32
    return %arg0, %c0_i32, %c0_i32_0 : i32, i32, i32
  }
  func.func @transform_13(%arg0: i32) -> (i32, i32) {
    %c0_i32 = arith.constant 0 : i32
    %c0_i32_0 = arith.constant 0 : i32
    %c0_i32_1 = arith.constant 0 : i32
    return %c0_i32, %c0_i32_0 : i32, i32
  }
  func.func @transform_14(%arg0: i32) -> (i32, i32) {
    %c0_i32 = arith.constant 0 : i32
    %c0_i32_0 = arith.constant 0 : i32
    %c0_i32_1 = arith.constant 0 : i32
    return %c0_i32, %c0_i32_0 : i32, i32
  }
  func.func @transform_15(%arg0: i32) -> (i32, i32) {
    %c0_i32 = arith.constant 0 : i32
    %c0_i32_0 = arith.constant 0 : i32
    %c0_i32_1 = arith.constant 0 : i32
    return %c0_i32, %c0_i32_0 : i32, i32
  }
  func.func @transform_16(%arg0: i32) -> (i32, i32) {
    %c0_i32 = arith.constant 0 : i32
    %c0_i32_0 = arith.constant 0 : i32
    %c0_i32_1 = arith.constant 0 : i32
    return %c0_i32, %c0_i32_0 : i32, i32
  }
  func.func @transform_17(%arg0: i32) -> (i32, i32) {
    %c0_i32 = arith.constant 0 : i32
    %c0_i32_0 = arith.constant 0 : i32
    %c0_i32_1 = arith.constant 0 : i32
    return %c0_i32, %c0_i32_0 : i32, i32
  }
}

</mosaic_0001>

<bundles_post_ra>
// kernel: tpu_custom_call.1
= control target key start
LH: loop header
LB: loop body
LE: loop exit
PB: predicated region body
PF: predicated region fallthrough
CT: control target
= control target key end

     0   :  { %s10357_s0 = inlined_call_operand.vmem [shape: f32[16,32], index: 0, kind: input, shape index: {}]   ;;  %s10358_s1 = inlined_call_operand.hbm [shape: f32[2,9,32,32], index: 1, kind: input, shape index: {}]   ;;  %s10359_s2 = inlined_call_operand.hbm [shape: f32[2,9,32,32], index: 2, kind: input, shape index: {}]   ;;  %s10360_s3 = inlined_call_operand.hbm [shape: f32[2,9,32,32], index: 3, kind: input, shape index: {}]   ;;  %s10361_s4 = inlined_call_operand.hbm [shape: f32[2,9,32,32], index: 4, kind: input, shape index: {}]   ;;  %s10362_s5 = inlined_call_operand.vmem [shape: f32[2,1,32], index: 5, kind: input, shape index: {}]   ;;  %s10363_s6 = inlined_call_operand.vmem [shape: f32[2,1,32], index: 6, kind: input, shape index: {}]   ;;  %s10364_s7 = inlined_call_operand.vmem [shape: f32[2,1,32], index: 7, kind: input, shape index: {}]   ;;  %s10365_s8 = inlined_call_operand.vmem [shape: f32[2,1,32], index: 8, kind: input, shape index: {}]   ;;  %s10366_s9 = inlined_call_operand.vmem [shape: f32[2,32,160], index: 9, kind: input, shape index: {}]   ;;  %s10367_s10 = inlined_call_operand.vmem [shape: f32[2,1,160], index: 10, kind: input, shape index: {}]   ;;  %s10368_s11 = inlined_call_operand.vmem [shape: f32[2,160,32], index: 11, kind: input, shape index: {}]   ;;  %s10369_s12 = inlined_call_operand.vmem [shape: f32[2,1,32], index: 12, kind: input, shape index: {}]   ;;  %s10370_s13 = inlined_call_operand.vmem [shape: f32[32,4], index: 13, kind: input, shape index: {}]   ;;  %s10371_s14 = inlined_call_operand.vmem [shape: f32[1,4], index: 14, kind: input, shape index: {}]   ;;  %s10372_s15 = inlined_call_operand.vmem [shape: f32[2,4], index: 15, kind: input, shape index: {}]   ;;  %s10373_s16 = inlined_call_operand.hbm [shape: f32[2,4], index: 16, kind: output, shape index: {0}]   ;;  %s10374_s17 = inlined_call_operand.hbm [shape: f32[1,1], index: 17, kind: output, shape index: {1}]  }
   0x1   :  { %10389 = sst [smem:[#allocation22_spill]] %s10357_s0 }
   0x2   :  { %10390 = sst [smem:[#allocation23_spill]] %s10358_s1 }
   0x3   :  { %10391 = sst [smem:[#allocation24_spill]] %s10359_s2 }
   0x4   :  { %10392 = sst [smem:[#allocation25_spill]] %s10360_s3 }
   0x5   :  { %10393 = sst [smem:[#allocation26_spill]] %s10367_s10 }
   0x6   :  { %10394 = sst [smem:[#allocation27_spill]] %s10368_s11 }
   0x7   :  { %10395 = sst [smem:[#allocation28_spill]] %s10369_s12 }
   0x8   :  { %10396 = sst [smem:[#allocation29_spill]] %s10370_s13 }
   0x9   :  { %10397 = sst [smem:[#allocation30_spill]] %s10371_s14 }
   0xa   :  { %10398 = sst [smem:[#allocation31_spill]] %s10372_s15 }
   0xb   :  { %10399 = sst [smem:[#allocation32_spill]] %s10373_s16 }
   0xc   :  { %10400 = sst [smem:[#allocation33_spill]] %s10374_s17 }
   0xd   :  { %23 = vsyncpa [#allocation4], 0 }
   0xe   :  { %25 = vsyncpa [#allocation4 + $0x1], 0 }
   0xf   :  { %26 = vsyncpa [#allocation7], 0 }
  0x10   :  { %28 = vsyncpa [#allocation7 + $0x1], 0 }
  0x11   :  { %29 = vsyncpa [#allocation10], 0 }
  0x12   :  { %31 = vsyncpa [#allocation10 + $0x1], 0 }
  0x13   :  { %32 = vsyncpa [#allocation5], 0 }
  0x14   :  { %33 = vsyncpa [#allocation13], 0  ;;  %s9187_s24 = smov 0   ;;  %s9189_s25 = smov 0  }
  0x15   :  { %s9191_s26 = smov 0   ;;  %s9193_s27 = smov 0  }
  0x16 LB: > { %10401 = sst [smem:[#allocation19_spill]] %s9077_s26  ;;  %s9206_s28 = sadd.s32 4294967295, %s9081_s27   ;;  %s9081_s27 = sphi %s9193_s27, %s10432_s27   ;;  %s9077_s26 = sphi %s9191_s26, %s10434_s26   ;;  %s9073_s25 = sphi %s9189_s25, %s10436_s25   ;;  %s9069_s24 = sphi %s9187_s24, %s10435_s24  }
  0x17   : > { %s9209_s29 = sadd.s32 1, %s9081_s27   ;;  %s67_s30 = sadd.s32 1, %s9077_s26 }
  0x18   : > { %10402 = sst [smem:[#allocation20_spill]] %s9209_s29  ;;  %s64_s0 = ssub.s32 %s9081_s27, %s9209_s29 }
  0x19   : > { %p65_p0 = scmp.eq.s32.totalorder %s64_s0, 0  ;;  %p74_p1 = scmp.ne.s32.totalorder %s9077_s26, %s9073_s25 }
  0x1a   : > { %p75_p2 = scmp.eq.s32.totalorder %s9081_s27, 0  ;;  %p80_p3 = scmp.ne.s32.totalorder %s9073_s25, %s9069_s24 }
  0x1b   : > { %s9219_s18 = scalar_select %p65_p0, %s9077_s26, %s67_s30  }
  0x1c   : > { %p76_p4 = por %p75_p2, %p74_p1  ;;  %p81_p5 = scmp.eq.s32.totalorder %s9206_s28, 0 }
  0x1d   : > { %10403 = sst [smem:[#allocation21_spill]] %s9219_s18  ;;  %p8722_p6 = scmp.lt.s32.totalorder %s9081_s27, 2 }
  0x1e   : > { %p9223_p7 = por %p81_p5, %p80_p3  ;;  %s9228_s1 = sand.u32 1, %s9077_s26  }
  0x1f   : > { %s9231_s20 = smul.u32 288, %s9228_s1  ;;  %p9233_p8 = pnand %p8722_p6, %p76_p4 }
  0x20   : > { %s10404_s19 = scalar_select %p9223_p7, 1, 0 }
  0x21   : > { %s9238_s22 = smul.u32 4608, %s9081_s27  ;;  %s528_s23 = sand.u32 1, %s9081_s27  }
  0x22   : > { %s10406_s2 = sld [smem:[#allocation24_spill]]  ;;  %s532_s18 = scalar_lea.vmem [#allocation6], %s9231_s20 }
  0x23   : > { %s539_s26 = sshll.u32 %s532_s18, 4  ;;  %s9252_s29 = scalar_lea.sflag [#allocation7], %s528_s23  ;;  %s9249_s26 = int_to_ptr.vmem [resolvable:$true] %s539_s26 }
  0x24   : > { %p9258_p12 = pneg %p9233_p8 }
  0x28   : > { %s9245_s30 = scalar_lea.hbm %s10406_s2, %s9238_s22  ;;  %s8864_s18 = scalar_lea.hbm %s10406_s2, 9216 }
  0x29   : > { %s8859_s17 = scalar_lea.hbm %s9245_s30, 4608  ;;  %p8865_p1 = scmp.lt.u32.totalorder %s9245_s30, %s10406_s2 }
  0x2a   : > { %p8860_p11 = scmp.ne.s32.totalorder %s9245_s30, %s8859_s17  ;;  %p8866_p2 = scmp.lt.u32.totalorder %s8864_s18, %s8859_s17 }
  0x2b   : > { %p8868_p4 = scmp.lt.u32.totalorder %s8859_s17, %s9245_s30 }
  0x2c   : > { %p8862_p13 = pnand %p9258_p12, %p8860_p11  ;;  %p8867_p3 = por %p8866_p2, %p8865_p1 }
  0x2e   : > { %p8863_p0 = pneg %p8862_p13  ;;  %p8869_p5 = por %p8868_p4, %p8867_p3 }
  0x30   : > { %p8870_p6 = pnand %p8869_p5, %p8863_p0 }
  0x32   : > { %8873 = shalt.err (!%p8870_p6)
}
  0x33   : > { %s8874_s23 = scalar_lea.vmem %s9249_s26, 4608  ;;  %s9083_s24 = smov [#allocation6]  }
  0x34   : > { %p8875_p11 = scmp.ne.s32.totalorder %s9249_s26, %s8874_s23  ;;  %s8879_s0 = sshll.u32 %s9083_s24, 4  ;;  %s8880_s0 = int_to_ptr.vmem [resolvable:$false] %s8879_s0 }
  0x35   : > { %s8881_s14 = scalar_lea.vmem %s8880_s0, 9216  ;;  %p8882_p10 = scmp.lt.s32.totalorder %s9249_s26, %s8880_s0 }
  0x36   : > { %p8877_p13 = pnand %p8875_p11, %p9258_p12  ;;  %p8883_p7 = scmp.lt.s32.totalorder %s8881_s14, %s8874_s23 }
  0x38   : > { %p8878_p9 = pneg %p8877_p13  ;;  %p8884_p1 = por %p8883_p7, %p8882_p10 }
  0x3a   : > { %p8885_p2 = pnand %p8884_p1, %p8878_p9 }
  0x3c   : > { %8888 = shalt.err (!%p8885_p2)
}
  0x3d   : > { %s10384_s15 = smov 128   ;;  %s10386_s17 = smov 8  }
  0x3e   : > { %8715 = dma.hbm_to_vmem [thread:$0]  (!%p9233_p8), %s9245_s30, 4608, %s9249_s26, %s9252_s29, %s10384_s15, %s10384_s15, %s10386_s17  }
  0x3f   : > { %p10408_p7 = scmp.lt.s32.totalorder %s9081_s27, 3  ;;  %p10409_p9 = scmp.ge.s32.totalorder %s9081_s27, 1 }
  0x40   : > { %s10411_s0 = sld [smem:[#allocation23_spill]]  ;;  %s511_s2 = scalar_lea.vmem [#allocation3], %s9231_s20 }
  0x41   : > { %p9289_p10 = pnand %p10409_p9, %p10408_p7  ;;  %s518_s13 = sshll.u32 %s511_s2, 4  ;;  %s9300_s13 = int_to_ptr.vmem [resolvable:$true] %s518_s13 }
  0x42   : > { %s10412_s3 = sld [smem:[#allocation25_spill]]  ;;  %s508_s15 = scalar_lea.sflag [#allocation4], %s9228_s1 }
  0x43   : > { %s10410_s18 = scalar_select %p9289_p10, 1, 0 }
  0x46   : > { %s9297_s14 = scalar_lea.hbm %s10411_s0, %s9238_s22  ;;  %s8894_s11 = scalar_lea.hbm %s10411_s0, 9216 }
  0x47   : > { %s8889_s17 = scalar_lea.hbm %s9297_s14, 4608  ;;  %p8895_p5 = scmp.lt.u32.totalorder %s9297_s14, %s10411_s0 }
  0x48   : > { %s9306_s27 = scalar_lea.hbm %s10412_s3, %s9238_s22  ;;  %p8890_p0 = scmp.ne.s32.totalorder %s9297_s14, %s8889_s17 }
  0x49   : > { %p8896_p6 = scmp.lt.u32.totalorder %s8894_s11, %s8889_s17  ;;  %p8898_p13 = scmp.lt.u32.totalorder %s8889_s17, %s9297_s14 }
  0x4a   : > { %p8892_p3 = pnand %p8890_p0, %p9258_p12 }
  0x4b   : > { %p8897_p11 = por %p8896_p6, %p8895_p5 }
  0x4c   : > { %p8893_p4 = pneg %p8892_p3 }
  0x4d   : > { %p8899_p1 = por %p8898_p13, %p8897_p11 }
  0x4f   : > { %p8900_p2 = pnand %p8899_p1, %p8893_p4 }
  0x51   : > { %8903 = shalt.err (!%p8900_p2)
}
  0x52   : > { %s8904_s2 = scalar_lea.vmem %s9300_s13, 4608  ;;  %s9086_s26 = smov [#allocation3]  }
  0x53   : > { %p8905_p7 = scmp.ne.s32.totalorder %s9300_s13, %s8904_s2  ;;  %s8909_s30 = sshll.u32 %s9086_s26, 4  ;;  %s8910_s30 = int_to_ptr.vmem [resolvable:$false] %s8909_s30 }
  0x54   : > { %s8911_s10 = scalar_lea.vmem %s8910_s30, 9216  ;;  %p8912_p3 = scmp.lt.s32.totalorder %s9300_s13, %s8910_s30 }
  0x55   : > { %p8907_p9 = pnand %p8905_p7, %p9258_p12  ;;  %p8913_p10 = scmp.lt.s32.totalorder %s8911_s10, %s8904_s2 }
  0x57   : > { %p8908_p0 = pneg %p8907_p9  ;;  %p8914_p5 = por %p8913_p10, %p8912_p3 }
  0x59   : > { %p8915_p6 = pnand %p8914_p5, %p8908_p0 }
  0x5b   : > { %8918 = shalt.err (!%p8915_p6)
}
  0x5c   : > { %s10413_s11 = smov 8   ;;  %s10414_s12 = smov 128  }
  0x5d   : > { %8712 = dma.hbm_to_vmem [thread:$0]  (!%p9233_p8), %s9297_s14, 4608, %s9300_s13, %s508_s15, %s10414_s12, %s10414_s12, %s10413_s11  }
  0x5e   : > { %s553_s17 = scalar_lea.vmem [#allocation8], %s9231_s20  ;;  %s8919_s24 = scalar_lea.hbm %s9306_s27, 4608 }
  0x5f   : > { %s560_s23 = sshll.u32 %s553_s17, 4  ;;  %p8920_p10 = scmp.ne.s32.totalorder %s9306_s27, %s8919_s24  ;;  %s9336_s23 = int_to_ptr.vmem [resolvable:$true] %s560_s23 }
  0x60   : > { %s8924_s30 = scalar_lea.hbm %s10412_s3, 9216  ;;  %p8925_p13 = scmp.lt.u32.totalorder %s9306_s27, %s10412_s3 }
  0x61   : > { %p8922_p4 = pnand %p8920_p10, %p9258_p12  ;;  %p8926_p1 = scmp.lt.u32.totalorder %s8924_s30, %s8919_s24 }
  0x62   : > { %p8928_p7 = scmp.lt.u32.totalorder %s8919_s24, %s9306_s27 }
  0x63   : > { %p8923_p11 = pneg %p8922_p4  ;;  %p8927_p2 = por %p8926_p1, %p8925_p13 }
  0x65   : > { %p8929_p9 = por %p8928_p7, %p8927_p2 }
  0x67   : > { %p8930_p0 = pnand %p8929_p9, %p8923_p11 }
  0x69   : > { %8933 = shalt.err (!%p8930_p0)
}
  0x6a   : > { %s8934_s13 = scalar_lea.vmem %s9336_s23, 4608  ;;  %s9087_s15 = smov [#allocation8]  }
  0x6b   : > { %p8935_p3 = scmp.ne.s32.totalorder %s9336_s23, %s8934_s13  ;;  %s8939_s14 = sshll.u32 %s9087_s15, 4  ;;  %s8940_s14 = int_to_ptr.vmem [resolvable:$false] %s8939_s14 }
  0x6c   : > { %s8941_s0 = scalar_lea.vmem %s8940_s14, 9216  ;;  %p8942_p10 = scmp.lt.s32.totalorder %s9336_s23, %s8940_s14 }
  0x6d   : > { %p8937_p5 = pnand %p8935_p3, %p9258_p12  ;;  %p8943_p4 = scmp.lt.s32.totalorder %s8941_s0, %s8934_s13 }
  0x6f   : > { %p8938_p6 = pneg %p8937_p5  ;;  %p8944_p13 = por %p8943_p4, %p8942_p10 }
  0x71   : > { %p8945_p1 = pnand %p8944_p13, %p8938_p6 }
  0x73   : > { %8948 = shalt.err (!%p8945_p1)
}
  0x74   : > { %8718 = dma.hbm_to_vmem [thread:$0]  (!%p9233_p8), %s9306_s27, 4608, %s9336_s23, %s9252_s29, %s10414_s12, %s10414_s12, %s10413_s11  }
  0x75   : > { %s9367_s2 = scalar_lea.hbm %s10361_s4, %s9238_s22  ;;  %s574_s26 = scalar_lea.vmem [#allocation9], %s9231_s20 }
  0x76   : > { %s581_s30 = sshll.u32 %s574_s26, 4  ;;  %s571_s10 = scalar_lea.sflag [#allocation10], %s9228_s1  ;;  %s9370_s30 = int_to_ptr.vmem [resolvable:$true] %s581_s30 }
  0x77   : > { %s8949_s13 = scalar_lea.hbm %s9367_s2, 4608  ;;  %s8954_s23 = scalar_lea.hbm %s10361_s4, 9216 }
  0x78   : > { %p8950_p11 = scmp.ne.s32.totalorder %s9367_s2, %s8949_s13  ;;  %p8955_p9 = scmp.lt.u32.totalorder %s9367_s2, %s10361_s4 }
  0x79   : > { %p8956_p0 = scmp.lt.u32.totalorder %s8954_s23, %s8949_s13  ;;  %p8958_p5 = scmp.lt.u32.totalorder %s8949_s13, %s9367_s2 }
  0x7a   : > { %p8952_p2 = pnand %p8950_p11, %p9258_p12 }
  0x7b   : > { %p8957_p3 = por %p8956_p0, %p8955_p9 }
  0x7c   : > { %p8953_p7 = pneg %p8952_p2 }
  0x7d   : > { %p8959_p6 = por %p8958_p5, %p8957_p3 }
  0x7f   : > { %p8960_p10 = pnand %p8959_p6, %p8953_p7 }
  0x81   : > { %8963 = shalt.err (!%p8960_p10)
}
  0x82   : > { %s8964_s20 = scalar_lea.vmem %s9370_s30, 4608  ;;  %s9088_s14 = smov [#allocation9]  }
  0x83   : > { %p8965_p4 = scmp.ne.s32.totalorder %s9370_s30, %s8964_s20  ;;  %s8969_s0 = sshll.u32 %s9088_s14, 4  ;;  %s8970_s0 = int_to_ptr.vmem [resolvable:$false] %s8969_s0 }
  0x84   : > { %s8971_s17 = scalar_lea.vmem %s8970_s0, 9216  ;;  %p8972_p11 = scmp.lt.s32.totalorder %s9370_s30, %s8970_s0 }
  0x85   : > { %p8967_p13 = pnand %p8965_p4, %p9258_p12  ;;  %p8973_p2 = scmp.lt.s32.totalorder %s8971_s17, %s8964_s20 }
  0x87   : > { %p8968_p1 = pneg %p8967_p13  ;;  %p8974_p9 = por %p8973_p2, %p8972_p11 }
  0x89   : > { %p8975_p0 = pnand %p8974_p9, %p8968_p1 }
  0x8b   : > { %8978 = shalt.err (!%p8975_p0)
}
  0x8c   : > { %8721 = dma.hbm_to_vmem [thread:$0]  (!%p9233_p8), %s9367_s2, 4608, %s9370_s30, %s571_s10, %s10414_s12, %s10414_s12, %s10413_s11  }
  0x8d   : > { %p10415_p12 = scmp.ne.s32.totalorder %s10410_s18, 0 }
  0x8e   : > { %s648_s16 = sand.u32 (!%p10415_p12), 1, %s9073_s25   ;;  %p10416_p7 = scmp.ne.s32.totalorder (!%p10415_p12), %s10404_s19, 0 }
  0x8f   : > { %646 = sbr.rel (%p10415_p12) target bundleno = 3445 (0xd75), region = 84  ;;  %s649_s26 = scalar_lea.sflag (!%p10415_p12), [#allocation4], %s648_s16 }
  0x90   : > { %s8691_s24 = smul.u32 (!%p10415_p12), 288, %s648_s16 }
  0x92   : > { %s9402_s13 = scalar_lea.vmem (!%p10415_p12), [#allocation3], %s8691_s24 }
  0x96   : > { %9048 = dma.done.wait (%p10416_p7), %s649_s26, 4608  }
  0x97   : > { %9050 = vsyncadd (%p10416_p7), %s649_s26, 4294962688  ;;  %s657_s1 = sand.u32 1, %s9206_s28   ;;  %s9409_s11 = scalar_lea.vmem [#allocation6], %s8691_s24 }
  0x98   : > { %s658_s21 = scalar_lea.sflag [#allocation7], %s657_s1 }
  0x99   : > { %9052 = dma.done.wait (%p10416_p7), %s658_s21, 9216  }
  0x9a   : > { %9054 = vsyncadd (%p10416_p7), %s658_s21, 4294958080  ;;  %s9415_s18 = scalar_lea.vmem [#allocation8], %s8691_s24  ;;  %s676_s12 = scalar_lea.sflag [#allocation10], %s648_s16 }
  0x9b   : > { %s9417_s2 = scalar_lea.vmem [#allocation9], %s8691_s24 }
  0x9c   : > { %9056 = dma.done.wait (%p10416_p7), %s676_s12, 4608  }
  0x9d   : > { %9058 = vsyncadd (%p10416_p7), %s676_s12, 4294962688  ;;  %p769_p8 = scmp.lt.s32.totalorder %s9206_s28, 1  ;;  %s10417_s27 = sld [smem:[#allocation26_spill]] }
  0x9e   : > { %s10418_s20 = sld [smem:[#allocation28_spill]]  ;;  %s10419_s17 = sld [smem:[#allocation27_spill]] }
  0x9f   : > { %s9425_s30 = scalar_select %p769_p8, %s9206_s28, 1 }
  0xa0   : > { %p7325_p3 = scmp.ne.s32.totalorder %s9206_s28, 0 }
  0xa1   : > { %s7470_s24 = sshll.u32 %s9425_s30, 6  ;;  %s7323_s26 = sshll.u32 %s9425_s30, 1  ;;  %vm804_vm0 = vcmask (!%p7325_p3), 261120  }
  0xa2   : > { %s9448_s12 = scalar_lea.vmem %s10366_s9, %s7470_s24  ;;  %s8692_s19 = smul.u32 160, %s9425_s30 }
  0xa3   : > { %s9453_s23 = scalar_lea.vmem %s10417_s27, %s7323_s26  ;;  %801 = sbr.rel (%p7325_p3) target bundleno = 173 (0xad), region = 104 }
  0xa4   : > { %s797_s14 = scalar_lea.vmem %s10418_s20, %s9425_s30  ;;  %s9463_s16 = scalar_lea.vmem %s10419_s17, %s8692_s19 }
  0xa5   : > { %s10420_s21 = sld [smem:[#allocation22_spill]] (!%p7325_p3) }
  0xab   : > { %v802_v0 = vld [vmem:[%s10420_s21] sm:$0xff]  ;;  %v803_v1 = vld [vmem:[%s10420_s21 + $0x8] sm:$0xff] }
  0xac   : > { %805 = vst.msk [vmem:[#allocation2] sm:$0xff] %vm804_vm0, %v802_v0  ;;  %806 = vst.msk [vmem:[#allocation2 + $0x8] sm:$0xff] %vm804_vm0, %v803_v1 }
  0xad PF: > { %v809_v2 = vld [vmem:[%s9402_s13] sm:$0xff]  ;;  %v810_v3 = vld [vmem:[%s9402_s13 + $0x8] sm:$0xff]  ;;  %v811_v4 = vld [vmem:[%s9402_s13 + $0x10] sm:$0xff]  ;;  %vm953_vm1 = vcmask 261120   ;;  %vm9090_vm2 = vmmov 0   ;;  %vm4353_vm3 = vcmask 64512   ;;  %s10422_s22 = scalar_lea.vmem %s10363_s6, %s9425_s30  ;;  %s10425_s20 = scalar_lea.vmem %s10365_s8, %s9425_s30 }
  0xae   : > { %v8351_v5 = vpack.c.bf16 %v810_v3, %v809_v2  ;;  %v812_v6 = vld [vmem:[%s9402_s13 + $0x18] sm:$0xff]  ;;  %v813_v9 = vld [vmem:[%s9402_s13 + $0x20] sm:$0xff]  ;;  %v814_v10 = vld [vmem:[%s9402_s13 + $0x28] sm:$0xff]  ;;  %p7461_p5 = scmp.ne.s32.totalorder %s9206_s28, 1 }
  0xaf   : > { %v8355_v8 = vpack.c.bf16 %v812_v6, %v811_v4  ;;  %v8359_v11 = vpack.c.bf16 %v814_v10, %v813_v9  ;;  %v815_v12 = vld [vmem:[%s9402_s13 + $0x30] sm:$0xff]  ;;  %v816_v13 = vld [vmem:[%s9402_s13 + $0x38] sm:$0xff]  ;;  %v825_v14 = vld [vmem:[%s9402_s13 + $0x80] sm:$0xff]  ;;  %s10426_s24 = sld [smem:[#allocation29_spill]] (!%p7461_p5)  ;;  %vm9093_vm4 = vmmov (!%p7461_p5), 0   ;;  %vm6970_vm5 = vcmask (!%p7461_p5), 1041409  }
  0xb0   : > { %8352 = vmatprep.subr.bf16.mxu1 %v8351_v5  ;;  %v826_v15 = vld [vmem:[%s9402_s13 + $0x88] sm:$0xff]  ;;  %v827_v16 = vld [vmem:[%s9402_s13 + $0x90] sm:$0xff]  ;;  %v828_v18 = vld [vmem:[%s9402_s13 + $0x98] sm:$0xff]  ;;  %v8363_v22 = vpack.c.bf16 %v816_v13, %v815_v12  ;;  %vm7044_vm6 = vcmask (!%p7461_p5), 25600   ;;  %s10429_s10 = sld [smem:[#allocation31_spill]] (!%p7461_p5)  ;;  %vm7075_vm7 = vcmask (!%p7461_p5), 1041408  }
  0xb1   : > { %8354 = vmatpush3.bf16.msra.mxu1 %v8351_v5  ;;  %v8383_v17 = vpack.c.bf16 %v826_v15, %v825_v14  ;;  %v8387_v20 = vpack.c.bf16 %v828_v18, %v827_v16  ;;  %v833_v21 = vld [vmem:[%s9402_s13 + $0xc0] sm:$0xff]  ;;  %v834_v23 = vld [vmem:[%s9402_s13 + $0xc8] sm:$0xff]  ;;  %v835_v27 = vld [vmem:[%s9402_s13 + $0xd0] sm:$0xff]  ;;  %vm7085_vm8 = vcmask (!%p7461_p5), 0  }
  0xb2   : > { %8356 = vmatprep.subr.bf16.mxu1 %v8355_v8  ;;  %v817_v24 = vld [vmem:[%s9402_s13 + $0x40] sm:$0xff]  ;;  %v818_v25 = vld [vmem:[%s9402_s13 + $0x48] sm:$0xff]  ;;  %v8399_v26 = vpack.c.bf16 %v834_v23, %v833_v21  ;;  %v836_v28 = vld [vmem:[%s9402_s13 + $0xd8] sm:$0xff] }
  0xb3   : > { %v9476_v7 = vld [vmem:[#allocation2] sm:$0xff]  ;;  %v9490_v19 = vld [vmem:[#allocation2 + $0x8] sm:$0xff]  ;;  %8384 = vmatprep.subr.bf16.mxu0 %v8383_v17  ;;  %v8367_v29 = vpack.c.bf16 %v818_v25, %v817_v24  ;;  %v8403_v32 = vpack.c.bf16 %v836_v28, %v835_v27  ;;  %v841_v33 = vld [vmem:[%s9402_s13 + $0x100] sm:$0xff] }
  0xb4   : > { %7772 = vmatprep.mubr.msk.f32.mxu1 %vm953_vm1, %v9476_v7  ;;  %7816 = vmatprep.mubr.msk.f32.mxu0 %vm953_vm1, %v9476_v7  ;;  %v819_v30 = vld [vmem:[%s9402_s13 + $0x50] sm:$0xff]  ;;  %v820_v31 = vld [vmem:[%s9402_s13 + $0x58] sm:$0xff]  ;;  %v842_v34 = vld [vmem:[%s9402_s13 + $0x108] sm:$0xff] }
  0xb5   : > { %8358 = vmatpush3.bf16.msra.mxu1 %v8355_v8  ;;  %8386 = vmatpush3.bf16.msra.mxu0 %v8383_v17  ;;  %v8371_v35 = vpack.c.bf16 %v820_v31, %v819_v30  ;;  %v821_v36 = vld [vmem:[%s9402_s13 + $0x60] sm:$0xff]  ;;  %v822_v37 = vld [vmem:[%s9402_s13 + $0x68] sm:$0xff]  ;;  %v8415_v38 = vpack.c.bf16 %v842_v34, %v841_v33  ;;  %v843_v39 = vld [vmem:[%s9402_s13 + $0x110] sm:$0xff]  ;;  %s10427_s1 = smov (!%p7461_p5), %s10426_s24 }
  0xb6   : > { %8360 = vmatprep.subr.bf16.mxu1 %v8359_v11  ;;  %8388 = vmatprep.subr.bf16.mxu0 %v8387_v20  ;;  %v844_v40 = vld [vmem:[%s9402_s13 + $0x118] sm:$0xff]  ;;  %v8375_v41 = vpack.c.bf16 %v822_v37, %v821_v36  ;;  %v823_v42 = vld [vmem:[%s9402_s13 + $0x70] sm:$0xff]  ;;  %v849_v45 = vld [vmem:[%s9409_s11 + $0x20] sm:$0xff] }
  0xb7   : > { %v824_v43 = vld [vmem:[%s9402_s13 + $0x78] sm:$0xff]  ;;  %v8419_v44 = vpack.c.bf16 %v844_v40, %v843_v39  ;;  %v850_v46 = vld [vmem:[%s9409_s11 + $0x28] sm:$0xff]  ;;  %v829_v48 = vld [vmem:[%s9402_s13 + $0xa0] sm:$0xff] }
  0xb8   : > { %7773 = vmatmul.mubr.msk.f32.vlgmr.msra.gmra.mrb[0].mxu1 %vm953_vm1, %v9490_v19  ;;  %v8379_v47 = vpack.c.bf16 %v824_v43, %v823_v42  ;;  %v830_v49 = vld [vmem:[%s9402_s13 + $0xa8] sm:$0xff]  ;;  %v8431_v50 = vpack.c.bf16 %v850_v46, %v849_v45  ;;  %v851_v51 = vld [vmem:[%s9409_s11 + $0x30] sm:$0xff]  ;;  %v852_v52 = vld [vmem:[%s9409_s11 + $0x38] sm:$0xff] }
  0xb9   : > { %8362 = vmatpush3.bf16.msra.mxu1 %v8359_v11  ;;  %7783 = vmatprep.mubr.msk.f32.mxu1 %vm953_vm1, %v9476_v7  ;;  %v8391_v53 = vpack.c.bf16 %v830_v49, %v829_v48  ;;  %v831_v54 = vld [vmem:[%s9402_s13 + $0xb0] sm:$0xff]  ;;  %v832_v55 = vld [vmem:[%s9402_s13 + $0xb8] sm:$0xff]  ;;  %v8435_v56 = vpack.c.bf16 %v852_v52, %v851_v51  ;;  %v857_v57 = vld [vmem:[%s9409_s11 + $0x60] sm:$0xff] }
  0xba   : > { %8364 = vmatprep.subr.bf16.mxu1 %v8363_v22  ;;  %8390 = vmatpush3.bf16.msra.mxu0 %v8387_v20  ;;  %v858_v58 = vld [vmem:[%s9409_s11 + $0x68] sm:$0xff]  ;;  %v8395_v59 = vpack.c.bf16 %v832_v55, %v831_v54  ;;  %v837_v60 = vld [vmem:[%s9402_s13 + $0xe0] sm:$0xff]  ;;  %v859_v63 = vld [vmem:[%s9409_s11 + $0x70] sm:$0xff] }
  0xbb   : > { %8400 = vmatprep.subr.bf16.mxu0 %v8399_v26  ;;  %v838_v61 = vld [vmem:[%s9402_s13 + $0xe8] sm:$0xff]  ;;  %v8447_v62 = vpack.c.bf16 %v858_v58, %v857_v57  ;;  %v860_v0 = vld [vmem:[%s9409_s11 + $0x78] sm:$0xff]  ;;  %v839_v2 = vld [vmem:[%s9402_s13 + $0xf0] sm:$0xff] }
  0xbc   : > { %v8407_v1 = vpack.c.bf16 %v838_v61, %v837_v60  ;;  %v840_v3 = vld [vmem:[%s9402_s13 + $0xf8] sm:$0xff]  ;;  %v8451_v4 = vpack.c.bf16 %v860_v0, %v859_v63  ;;  %v865_v5 = vld [vmem:[%s9409_s11 + $0xa0] sm:$0xff]  ;;  %v866_v6 = vld [vmem:[%s9409_s11 + $0xa8] sm:$0xff] }
  0xbd   : > { %8366 = vmatpush3.bf16.msra.mxu1 %v8363_v22  ;;  %7817 = vmatmul.mubr.msk.f32.vlgmr.msra.gmra.mrb[0].mxu0 %vm953_vm1, %v9490_v19  ;;  %v8411_v8 = vpack.c.bf16 %v840_v3, %v839_v2  ;;  %v845_v9 = vld [vmem:[%s9409_s11] sm:$0xff]  ;;  %v846_v10 = vld [vmem:[%s9409_s11 + $0x8] sm:$0xff]  ;;  %v8463_v11 = vpack.c.bf16 %v866_v6, %v865_v5  ;;  %v867_v12 = vld [vmem:[%s9409_s11 + $0xb0] sm:$0xff] }
  0xbe   : > { %8368 = vmatprep.subr.bf16.mxu1 %v8367_v29  ;;  %8402 = vmatpush3.bf16.msra.mxu0 %v8399_v26  ;;  %v868_v13 = vld [vmem:[%s9409_s11 + $0xb8] sm:$0xff]  ;;  %v8423_v14 = vpack.c.bf16 %v846_v10, %v845_v9  ;;  %v847_v15 = vld [vmem:[%s9409_s11 + $0x10] sm:$0xff]  ;;  %v873_v18 = vld [vmem:[%s9409_s11 + $0xe0] sm:$0xff] }
  0xbf   : > { %7838 = vmatprep.mubr.msk.f32.mxu0 %vm953_vm1, %v9476_v7  ;;  %8404 = vmatprep.subr.bf16.mxu0 %v8403_v32  ;;  %v848_v16 = vld [vmem:[%s9409_s11 + $0x18] sm:$0xff]  ;;  %v8467_v17 = vpack.c.bf16 %v868_v13, %v867_v12  ;;  %v874_v20 = vld [vmem:[%s9409_s11 + $0xe8] sm:$0xff]  ;;  %v853_v22 = vld [vmem:[%s9409_s11 + $0x40] sm:$0xff] }
  0xc0   : > { %7784 = vmatmul.mubr.msk.f32.vlgmr.msra.gmra.mrb[2].mxu1 %vm953_vm1, %v9490_v19  ;;  %v8427_v21 = vpack.c.bf16 %v848_v16, %v847_v15  ;;  %v854_v23 = vld [vmem:[%s9409_s11 + $0x48] sm:$0xff]  ;;  %v8479_v24 = vpack.c.bf16 %v874_v20, %v873_v18  ;;  %v875_v25 = vld [vmem:[%s9409_s11 + $0xf0] sm:$0xff]  ;;  %v876_v26 = vld [vmem:[%s9409_s11 + $0xf8] sm:$0xff] }
  0xc1   : > { %8370 = vmatpush3.bf16.msra.mxu1 %v8367_v29  ;;  %7794 = vmatprep.mubr.msk.f32.mxu1 %vm953_vm1, %v9476_v7  ;;  %v8439_v27 = vpack.c.bf16 %v854_v23, %v853_v22  ;;  %v855_v28 = vld [vmem:[%s9409_s11 + $0x50] sm:$0xff]  ;;  %v856_v29 = vld [vmem:[%s9409_s11 + $0x58] sm:$0xff]  ;;  %v8483_v30 = vpack.c.bf16 %v876_v26, %v875_v25  ;;  %v862_v33 = vld [vmem:[%s9409_s11 + $0x88] sm:$0xff] }
  0xc2   : > { %8372 = vmatprep.subr.bf16.mxu1 %v8371_v35  ;;  %8406 = vmatpush3.bf16.msra.mxu0 %v8403_v32  ;;  %v8443_v31 = vpack.c.bf16 %v856_v29, %v855_v28  ;;  %v861_v32 = vld [vmem:[%s9409_s11 + $0x80] sm:$0xff]  ;;  %v864_v36 = vld [vmem:[%s9409_s11 + $0x98] sm:$0xff]  ;;  %v870_v39 = vld [vmem:[%s9409_s11 + $0xc8] sm:$0xff] }
  0xc3   : > { %8416 = vmatprep.subr.bf16.mxu0 %v8415_v38  ;;  %v8455_v34 = vpack.c.bf16 %v862_v33, %v861_v32  ;;  %v872_v42 = vld [vmem:[%s9409_s11 + $0xd8] sm:$0xff]  ;;  %v878_v45 = vld [vmem:[%s9409_s11 + $0x108] sm:$0xff]  ;;  %v885_v52 = vld [vmem:[%s9415_s18 + $0x20] sm:$0xff] }
  0xc4   : > { %v880_v48 = vld [vmem:[%s9409_s11 + $0x118] sm:$0xff]  ;;  %v882_v51 = vld [vmem:[%s9415_s18 + $0x8] sm:$0xff]  ;;  %v887_v58 = vld [vmem:[%s9415_s18 + $0x30] sm:$0xff] }
  0xc5   : > { %8374 = vmatpush3.bf16.msra.mxu1 %v8371_v35  ;;  %7839 = vmatmul.mubr.msk.f32.vlgmr.msra.gmra.mrb[2].mxu0 %vm953_vm1, %v9490_v19  ;;  %v863_v35 = vld [vmem:[%s9409_s11 + $0x90] sm:$0xff]  ;;  %v886_v54 = vld [vmem:[%s9415_s18 + $0x28] sm:$0xff]  ;;  %v884_v57 = vld [vmem:[%s9415_s18 + $0x18] sm:$0xff] }
  0xc6   : > { %8376 = vmatprep.subr.bf16.mxu1 %v8375_v41  ;;  %8418 = vmatpush3.bf16.msra.mxu0 %v8415_v38  ;;  %v8459_v37 = vpack.c.bf16 %v864_v36, %v863_v35  ;;  %v869_v38 = vld [vmem:[%s9409_s11 + $0xc0] sm:$0xff]  ;;  %v8503_v55 = vpack.c.bf16 %v886_v54, %v885_v52  ;;  %v888_v60 = vld [vmem:[%s9415_s18 + $0x38] sm:$0xff]  ;;  %v890_v63 = vld [vmem:[%s9415_s18 + $0x48] sm:$0xff] }
  0xc7   : > { %7860 = vmatprep.mubr.msk.f32.mxu0 %vm953_vm1, %v9476_v7  ;;  %8420 = vmatprep.subr.bf16.mxu0 %v8419_v44  ;;  %v8471_v40 = vpack.c.bf16 %v870_v39, %v869_v38  ;;  %v8507_v61 = vpack.c.bf16 %v888_v60, %v887_v58  ;;  %v893_v0 = vld [vmem:[%s9415_s18 + $0x60] sm:$0xff]  ;;  %v894_v2 = vld [vmem:[%s9415_s18 + $0x68] sm:$0xff]  ;;  %v892_v5 = vld [vmem:[%s9415_s18 + $0x58] sm:$0xff] }
  0xc8   : > { %7795 = vmatmul.mubr.msk.f32.vlgmr.msra.gmra.mrb[4].mxu1 %vm953_vm1, %v9490_v19  ;;  %v8519_v3 = vpack.c.bf16 %v894_v2, %v893_v0  ;;  %v895_v6 = vld [vmem:[%s9415_s18 + $0x70] sm:$0xff]  ;;  %v896_v9 = vld [vmem:[%s9415_s18 + $0x78] sm:$0xff]  ;;  %v898_v12 = vld [vmem:[%s9415_s18 + $0x88] sm:$0xff] }
  0xc9   : > { %8378 = vmatpush3.bf16.msra.mxu1 %v8375_v41  ;;  %7805 = vmatprep.mubr.msk.f32.mxu1 %vm953_vm1, %v9476_v7  ;;  %v871_v41 = vld [vmem:[%s9409_s11 + $0xd0] sm:$0xff]  ;;  %v8523_v10 = vpack.c.bf16 %v896_v9, %v895_v6  ;;  %v901_v13 = vld [vmem:[%s9415_s18 + $0xa0] sm:$0xff]  ;;  %v902_v15 = vld [vmem:[%s9415_s18 + $0xa8] sm:$0xff] }
  0xca   : > { %8380 = vmatprep.subr.bf16.mxu1 %v8379_v47  ;;  %8422 = vmatpush3.bf16.msra.mxu0 %v8419_v44  ;;  %v8475_v43 = vpack.c.bf16 %v872_v42, %v871_v41  ;;  %v877_v44 = vld [vmem:[%s9409_s11 + $0x100] sm:$0xff]  ;;  %v8535_v16 = vpack.c.bf16 %v902_v15, %v901_v13  ;;  %v900_v18 = vld [vmem:[%s9415_s18 + $0x98] sm:$0xff]  ;;  %v903_v20 = vld [vmem:[%s9415_s18 + $0xb0] sm:$0xff]  ;;  %v9089_v42 = vmov 0.0  }
  0xcb   : > { %8432 = vmatprep.subr.bf16.mxu0 %v8431_v50  ;;  %v8487_v46 = vpack.c.bf16 %v878_v45, %v877_v44  ;;  %v904_v22 = vld [vmem:[%s9415_s18 + $0xb8] sm:$0xff]  ;;  %v906_v25 = vld [vmem:[%s9415_s18 + $0xc8] sm:$0xff]  ;;  %v909_v26 = vld [vmem:[%s9415_s18 + $0xe0] sm:$0xff] }
  0xcc   : > { %v8539_v23 = vpack.c.bf16 %v904_v22, %v903_v20  ;;  %v910_v28 = vld [vmem:[%s9415_s18 + $0xe8] sm:$0xff]  ;;  %v911_v32 = vld [vmem:[%s9415_s18 + $0xf0] sm:$0xff]  ;;  %v913_v36 = vld [vmem:[%s9415_s18 + $0x100] sm:$0xff] }
  0xcd   : > { %8382 = vmatpush3.bf16.msra.mxu1 %v8379_v47  ;;  %7861 = vmatmul.mubr.msk.f32.vlgmr.msra.gmra.mrb[4].mxu0 %vm953_vm1, %v9490_v19  ;;  %v879_v47 = vld [vmem:[%s9409_s11 + $0x110] sm:$0xff]  ;;  %v8551_v29 = vpack.c.bf16 %v910_v28, %v909_v26  ;;  %s10421_s11 = scalar_lea.vmem %s10362_s5, %s9425_s30 }
  0xce   : > { %8392 = vmatprep.subr.bf16.mxu1 %v8391_v53  ;;  %8434 = vmatpush3.bf16.msra.mxu0 %v8431_v50  ;;  %v8491_v49 = vpack.c.bf16 %v880_v48, %v879_v47  ;;  %v881_v50 = vld [vmem:[%s9415_s18] sm:$0xff]  ;;  %v915_v39 = vld [vmem:[%s9415_s18 + $0x110] sm:$0xff] }
  0xcf   : > { %7882 = vmatprep.mubr.msk.f32.mxu0 %vm953_vm1, %v9476_v7  ;;  %8436 = vmatprep.subr.bf16.mxu0 %v8435_v56 }
  0xd0   : > { %7806 = vmatmul.mubr.msk.f32.vlgmr.msra.gmra.mrb[6].mxu1 %vm953_vm1, %v9490_v19 }
  0xd1   : > { %8394 = vmatpush3.bf16.msra.mxu1 %v8391_v53  ;;  %7827 = vmatprep.mubr.msk.f32.mxu1 %vm953_vm1, %v9476_v7  ;;  %v8495_v53 = vpack.c.bf16 %v882_v51, %v881_v50 }
  0xd2   : > { %8396 = vmatprep.subr.bf16.mxu1 %v8395_v59  ;;  %8438 = vmatpush3.bf16.msra.mxu0 %v8435_v56  ;;  %v883_v56 = vld [vmem:[%s9415_s18 + $0x10] sm:$0xff] }
  0xd3   : > { %8448 = vmatprep.subr.bf16.mxu0 %v8447_v62 }
  0xd5   : > { %8398 = vmatpush3.bf16.msra.mxu1 %v8395_v59  ;;  %7883 = vmatmul.mubr.msk.f32.vlgmr.msra.gmra.mrb[6].mxu0 %vm953_vm1, %v9490_v19  ;;  %v8499_v59 = vpack.c.bf16 %v884_v57, %v883_v56 }
  0xd6   : > { %8408 = vmatprep.subr.bf16.mxu1 %v8407_v1  ;;  %8450 = vmatpush3.bf16.msra.mxu0 %v8447_v62  ;;  %v889_v62 = vld [vmem:[%s9415_s18 + $0x40] sm:$0xff] }
  0xd7   : > { %7904 = vmatprep.mubr.msk.f32.mxu0 %vm953_vm1, %v9476_v7  ;;  %8452 = vmatprep.subr.bf16.mxu0 %v8451_v4 }
  0xd8   : > { %7828 = vmatmul.mubr.msk.f32.vlgmr.msra.gmra.mrb[8].mxu1 %vm953_vm1, %v9490_v19 }
  0xd9   : > { %8410 = vmatpush3.bf16.msra.mxu1 %v8407_v1  ;;  %7849 = vmatprep.mubr.msk.f32.mxu1 %vm953_vm1, %v9476_v7  ;;  %v8511_v1 = vpack.c.bf16 %v890_v63, %v889_v62 }
  0xda   : > { %8412 = vmatprep.subr.bf16.mxu1 %v8411_v8  ;;  %8454 = vmatpush3.bf16.msra.mxu0 %v8451_v4  ;;  %v891_v4 = vld [vmem:[%s9415_s18 + $0x50] sm:$0xff] }
  0xdb   : > { %8464 = vmatprep.subr.bf16.mxu0 %v8463_v11 }
  0xdd   : > { %8414 = vmatpush3.bf16.msra.mxu1 %v8411_v8  ;;  %7905 = vmatmul.mubr.msk.f32.vlgmr.msra.gmra.mrb[8].mxu0 %vm953_vm1, %v9490_v19  ;;  %v8515_v8 = vpack.c.bf16 %v892_v5, %v891_v4 }
  0xde   : > { %8424 = vmatprep.subr.bf16.mxu1 %v8423_v14  ;;  %8466 = vmatpush3.bf16.msra.mxu0 %v8463_v11  ;;  %v897_v11 = vld [vmem:[%s9415_s18 + $0x80] sm:$0xff] }
  0xdf   : > { %7926 = vmatprep.mubr.msk.f32.mxu0 %vm953_vm1, %v9476_v7  ;;  %8468 = vmatprep.subr.bf16.mxu0 %v8467_v17 }
  0xe0   : > { %7850 = vmatmul.mubr.msk.f32.vlgmr.msra.gmra.mrb[10].mxu1 %vm953_vm1, %v9490_v19 }
  0xe1   : > { %8426 = vmatpush3.bf16.msra.mxu1 %v8423_v14  ;;  %7871 = vmatprep.mubr.msk.f32.mxu1 %vm953_vm1, %v9476_v7  ;;  %v8527_v14 = vpack.c.bf16 %v898_v12, %v897_v11 }
  0xe2   : > { %8428 = vmatprep.subr.bf16.mxu1 %v8427_v21  ;;  %8470 = vmatpush3.bf16.msra.mxu0 %v8467_v17  ;;  %v899_v17 = vld [vmem:[%s9415_s18 + $0x90] sm:$0xff] }
  0xe3   : > { %8480 = vmatprep.subr.bf16.mxu0 %v8479_v24 }
  0xe5   : > { %8430 = vmatpush3.bf16.msra.mxu1 %v8427_v21  ;;  %7927 = vmatmul.mubr.msk.f32.vlgmr.msra.gmra.mrb[10].mxu0 %vm953_vm1, %v9490_v19  ;;  %v8531_v21 = vpack.c.bf16 %v900_v18, %v899_v17 }
  0xe6   : > { %8440 = vmatprep.subr.bf16.mxu1 %v8439_v27  ;;  %8482 = vmatpush3.bf16.msra.mxu0 %v8479_v24  ;;  %v905_v24 = vld [vmem:[%s9415_s18 + $0xc0] sm:$0xff] }
  0xe7   : > { %7948 = vmatprep.mubr.msk.f32.mxu0 %vm953_vm1, %v9476_v7  ;;  %8484 = vmatprep.subr.bf16.mxu0 %v8483_v30 }
  0xe8   : > { %7872 = vmatmul.mubr.msk.f32.vlgmr.msra.gmra.mrb[12].mxu1 %vm953_vm1, %v9490_v19 }
  0xe9   : > { %8442 = vmatpush3.bf16.msra.mxu1 %v8439_v27  ;;  %7893 = vmatprep.mubr.msk.f32.mxu1 %vm953_vm1, %v9476_v7  ;;  %v8543_v27 = vpack.c.bf16 %v906_v25, %v905_v24 }
  0xea   : > { %8444 = vmatprep.subr.bf16.mxu1 %v8443_v31  ;;  %8486 = vmatpush3.bf16.msra.mxu0 %v8483_v30  ;;  %v907_v30 = vld [vmem:[%s9415_s18 + $0xd0] sm:$0xff] }
  0xeb   : > { %8496 = vmatprep.subr.bf16.mxu0 %v8495_v53 }
  0xed   : > { %8446 = vmatpush3.bf16.msra.mxu1 %v8443_v31  ;;  %7949 = vmatmul.mubr.msk.f32.vlgmr.msra.gmra.mrb[12].mxu0 %vm953_vm1, %v9490_v19  ;;  %v908_v31 = vld [vmem:[%s9415_s18 + $0xd8] sm:$0xff] }
  0xee   : > { %8456 = vmatprep.subr.bf16.mxu1 %v8455_v34  ;;  %7970 = vmatprep.mubr.msk.f32.mxu0 %vm953_vm1, %v9476_v7  ;;  %v8547_v33 = vpack.c.bf16 %v908_v31, %v907_v30 }
  0xef   : > { %8498 = vmatpush3.bf16.msra.mxu0 %v8495_v53 }
  0xf0   : > { %7894 = vmatmul.mubr.msk.f32.vlgmr.msra.gmra.mrb[14].mxu1 %vm953_vm1, %v9490_v19  ;;  %8500 = vmatprep.subr.bf16.mxu0 %v8499_v59 }
  0xf1   : > { %8458 = vmatpush3.bf16.msra.mxu1 %v8455_v34  ;;  %7915 = vmatprep.mubr.msk.f32.mxu1 %vm953_vm1, %v9476_v7  ;;  %v912_v34 = vld [vmem:[%s9415_s18 + $0xf8] sm:$0xff] }
  0xf2   : > { %8460 = vmatprep.subr.bf16.mxu1 %v8459_v37  ;;  %v8555_v35 = vpack.c.bf16 %v912_v34, %v911_v32 }
  0xf3   : > { %8502 = vmatpush3.bf16.msra.mxu0 %v8499_v59 }
  0xf4   : > { %8512 = vmatprep.subr.bf16.mxu0 %v8511_v1 }
  0xf5   : > { %8462 = vmatpush3.bf16.msra.mxu1 %v8459_v37  ;;  %v914_v37 = vld [vmem:[%s9415_s18 + $0x108] sm:$0xff] }
  0xf6   : > { %8472 = vmatprep.subr.bf16.mxu1 %v8471_v40  ;;  %7971 = vmatmul.mubr.msk.f32.vlgmr.msra.gmra.mrb[14].mxu0 %vm953_vm1, %v9490_v19  ;;  %v8559_v38 = vpack.c.bf16 %v914_v37, %v913_v36 }
  0xf7   : > { %8514 = vmatpush3.bf16.msra.mxu0 %v8511_v1  ;;  %7992 = vmatprep.mubr.msk.f32.mxu0 %vm953_vm1, %v9476_v7 }
  0xf8   : > { %7916 = vmatmul.mubr.msk.f32.vlgmr.msra.gmra.mrb[16].mxu1 %vm953_vm1, %v9490_v19  ;;  %8516 = vmatprep.subr.bf16.mxu0 %v8515_v8 }
  0xf9   : > { %8474 = vmatpush3.bf16.msra.mxu1 %v8471_v40  ;;  %7937 = vmatprep.mubr.msk.f32.mxu1 %vm953_vm1, %v9476_v7  ;;  %v916_v40 = vld [vmem:[%s9415_s18 + $0x118] sm:$0xff] }
  0xfa   : > { %8476 = vmatprep.subr.bf16.mxu1 %v8475_v43  ;;  %v8563_v41 = vpack.c.bf16 %v916_v40, %v915_v39 }
  0xfb   : > { %8518 = vmatpush3.bf16.msra.mxu0 %v8515_v8 }
  0xfc   : > { %8528 = vmatprep.subr.bf16.mxu0 %v8527_v14 }
  0xfd   : > { %8478 = vmatpush3.bf16.msra.mxu1 %v8475_v43 }
  0xfe   : > { %8488 = vmatprep.subr.bf16.mxu1 %v8487_v46  ;;  %7993 = vmatmul.mubr.msk.f32.vlgmr.msra.gmra.mrb[16].mxu0 %vm953_vm1, %v9490_v19 }
  0xff   : > { %8530 = vmatpush3.bf16.msra.mxu0 %v8527_v14  ;;  %8014 = vmatprep.mubr.msk.f32.mxu0 %vm953_vm1, %v9476_v7 }
 0x100   : > { %7938 = vmatmul.mubr.msk.f32.vlgmr.msra.gmra.mrb[18].mxu1 %vm953_vm1, %v9490_v19  ;;  %8532 = vmatprep.subr.bf16.mxu0 %v8531_v21 }
 0x101   : > { %8490 = vmatpush3.bf16.msra.mxu1 %v8487_v46  ;;  %7959 = vmatprep.mubr.msk.f32.mxu1 %vm953_vm1, %v9476_v7 }
 0x102   : > { %8492 = vmatprep.subr.bf16.mxu1 %v8491_v49 }
 0x103   : > { %8534 = vmatpush3.bf16.msra.mxu0 %v8531_v21 }
 0x104   : > { %8544 = vmatprep.subr.bf16.mxu0 %v8543_v27 }
 0x105   : > { %8494 = vmatpush3.bf16.msra.mxu1 %v8491_v49 }
 0x106   : > { %8504 = vmatprep.subr.bf16.mxu1 %v8503_v55  ;;  %8015 = vmatmul.mubr.msk.f32.vlgmr.msra.gmra.mrb[18].mxu0 %vm953_vm1, %v9490_v19 }
 0x107   : > { %8546 = vmatpush3.bf16.msra.mxu0 %v8543_v27  ;;  %8036 = vmatprep.mubr.msk.f32.mxu0 %vm953_vm1, %v9476_v7 }
 0x108   : > { %7960 = vmatmul.mubr.msk.f32.vlgmr.msra.gmra.mrb[20].mxu1 %vm953_vm1, %v9490_v19  ;;  %8548 = vmatprep.subr.bf16.mxu0 %v8547_v33 }
 0x109   : > { %7981 = vmatprep.mubr.msk.f32.mxu1 %vm953_vm1, %v9476_v7  ;;  %8506 = vmatpush3.bf16.msra.mxu1 %v8503_v55 }
 0x10a   : > { %8508 = vmatprep.subr.bf16.mxu1 %v8507_v61 }
 0x10b   : > { %8550 = vmatpush3.bf16.msra.mxu0 %v8547_v33 }
 0x10c   : > { %8560 = vmatprep.subr.bf16.mxu0 %v8559_v38 }
 0x10d   : > { %8510 = vmatpush3.bf16.msra.mxu1 %v8507_v61 }
 0x10e   : > { %8520 = vmatprep.subr.bf16.mxu1 %v8519_v3  ;;  %8037 = vmatmul.mubr.msk.f32.vlgmr.msra.gmra.mrb[20].mxu0 %vm953_vm1, %v9490_v19 }
 0x10f   : > { %8562 = vmatpush3.bf16.msra.mxu0 %v8559_v38  ;;  %8058 = vmatprep.mubr.msk.f32.mxu0 %vm953_vm1, %v9476_v7 }
 0x110   : > { %7982 = vmatmul.mubr.msk.f32.vlgmr.msra.gmra.mrb[22].mxu1 %vm953_vm1, %v9490_v19  ;;  %8564 = vmatprep.subr.bf16.mxu0 %v8563_v41 }
 0x111   : > { %8522 = vmatpush3.bf16.msra.mxu1 %v8519_v3  ;;  %8003 = vmatprep.mubr.msk.f32.mxu1 %vm953_vm1, %v9476_v7 }
 0x112   : > { %8524 = vmatprep.subr.bf16.mxu1 %v8523_v10 }
 0x113   : > { %8566 = vmatpush3.bf16.msra.mxu0 %v8563_v41 }
 0x114   : > { %8081 = vmatprep.subr.mxu0 %v9089_v42 }
 0x115   : > { %8526 = vmatpush3.bf16.msra.mxu1 %v8523_v10 }
 0x116   : > { %8536 = vmatprep.subr.bf16.mxu1 %v8535_v16  ;;  %8059 = vmatmul.mubr.msk.f32.vlgmr.msra.gmra.mrb[22].mxu0 %vm953_vm1, %v9490_v19 }
 0x117   : > { %8083 = vmatprep.mubr.msk.f32.mxu0 %vm9090_vm2, %v9089_v42 }
 0x118   : > { %8004 = vmatmul.mubr.msk.f32.vlgmr.msra.gmra.mrb[24].mxu1 %vm953_vm1, %v9490_v19 }
 0x119   : > { %8538 = vmatpush3.bf16.msra.mxu1 %v8535_v16  ;;  %8025 = vmatprep.mubr.msk.f32.mxu1 %vm953_vm1, %v9476_v7 }
 0x11a   : > { %8540 = vmatprep.subr.bf16.mxu1 %v8539_v23 }
 0x11d   : > { %8542 = vmatpush3.bf16.msra.mxu1 %v8539_v23 }
 0x11e   : > { %8552 = vmatprep.subr.bf16.mxu1 %v8551_v29 }
 0x120   : > { %8026 = vmatmul.mubr.msk.f32.vlgmr.msra.gmra.mrb[26].mxu1 %vm953_vm1, %v9490_v19 }
 0x121   : > { %8554 = vmatpush3.bf16.msra.mxu1 %v8551_v29  ;;  %8047 = vmatprep.mubr.msk.f32.mxu1 %vm953_vm1, %v9476_v7 }
 0x122   : > { %8556 = vmatprep.subr.bf16.mxu1 %v8555_v35 }
 0x125   : > { %8558 = vmatpush3.bf16.msra.mxu1 %v8555_v35 }
 0x126   : > { %8061 = vmatprep.subr.mxu1 %v9089_v42 }
 0x128   : > { %8048 = vmatmul.mubr.msk.f32.vlgmr.msra.gmra.mrb[28].mxu1 %vm953_vm1, %v9490_v19 }
 0x129   : > { %8063 = vmatprep.mubr.msk.f32.mxu1 %vm9090_vm2, %v9089_v42 }
 0x18b   : > { %v7774_v43 = vpop.f32.mrb[0].mxu1 }
 0x18c   : > { %v1026_v44 = vpop.f32.mrb[1].mxu1 }
 0x190   : > { %v9698_v7 = vpop.f32.mrb[0].mxu0 }
 0x191   : > { %v1326_v45 = vpop.f32.mrb[1].mxu0 }
 0x193   : > { %v7785_v46 = vpop.f32.mrb[2].mxu1 }
 0x194   : > { %v1101_v47 = vpop.f32.mrb[3].mxu1 }
 0x198   : > { %v9700_v48 = vpop.f32.mrb[2].mxu0 }
 0x199   : > { %v9702_v49 = vpop.f32.mrb[3].mxu0 }
 0x19b   : > { %v7796_v50 = vpop.f32.mrb[4].mxu1 }
 0x19c   : > { %v1176_v51 = vpop.f32.mrb[5].mxu1 }
 0x1a0   : > { %v9704_v52 = vpop.f32.mrb[4].mxu0 }
 0x1a1   : > { %v9706_v53 = vpop.f32.mrb[5].mxu0 }
 0x1a3   : > { %v7807_v19 = vpop.f32.mrb[6].mxu1 }
 0x1a4   : > { %v1251_v54 = vpop.f32.mrb[7].mxu1 }
 0x1a8   : > { %v7884_v55 = vpop.f32.mrb[6].mxu0 }
 0x1a9   : > { %v1776_v56 = vpop.f32.mrb[7].mxu0 }
 0x1ab   : > { %v9708_v57 = vpop.f32.mrb[8].mxu1 }
 0x1ac   : > { %v1401_v58 = vpop.f32.mrb[9].mxu1 }
 0x1b0   : > { %v7906_v59 = vpop.f32.mrb[8].mxu0 }
 0x1b1   : > { %v1926_v60 = vpop.f32.mrb[9].mxu0 }
 0x1b3   : > { %v9710_v61 = vpop.f32.mrb[10].mxu1 }
 0x1b4   : > { %v9712_v62 = vpop.f32.mrb[11].mxu1 }
 0x1b8   : > { %v7928_v63 = vpop.f32.mrb[10].mxu0 }
 0x1b9   : > { %v2076_v0 = vpop.f32.mrb[11].mxu0 }
 0x1bb   : > { %v7873_v1 = vpop.f32.mrb[12].mxu1 }
 0x1bc   : > { %v1701_v2 = vpop.f32.mrb[13].mxu1 }
 0x1bd   : > { %8062 = vmatpush3.xpose.msk.msra.mxu1 %vm953_vm1, %v1701_v2 }
 0x1be   : > { %8066 = vmatprep.subr.mxu1 %v9089_v42 }
 0x1c0   : > { %8064 = vmatmul.mubr.msk.f32.vlgmr.msra.gmra.mrb[30].mxu1 %vm953_vm1, %v1026_v44  ;;  %v9720_v3 = vpop.f32.mrb[12].mxu0 }
 0x1c1   : > { %8067 = vmatpush3.xpose.msk.msra.mxu1 %vm953_vm1, %v7873_v1  ;;  %8068 = vmatprep.mubr.msk.f32.mxu1 %vm9090_vm2, %v9089_v42  ;;  %v2226_v4 = vpop.f32.mrb[13].mxu0 }
 0x1c2   : > { %8071 = vmatprep.subr.mxu1 %v9089_v42 }
 0x1c3   : > { %v7895_v5 = vpop.f32.mrb[14].mxu1 }
 0x1c4   : > { %v1851_v6 = vpop.f32.mrb[15].mxu1  ;;  %8069 = vmatmul.mubr.msk.f32.vlgmr.msra.gmra.mrb[32].mxu1 %vm953_vm1, %v7774_v43 }
 0x1c5   : > { %8072 = vmatpush3.xpose.msk.msra.mxu1 %vm953_vm1, %v1776_v56  ;;  %8082 = vmatpush3.xpose.msk.msra.mxu0 %vm953_vm1, %v1851_v6 }
 0x1c6   : > { %8073 = vmatprep.mubr.msk.f32.mxu1 %vm9090_vm2, %v9089_v42  ;;  %8076 = vmatprep.subr.mxu1 %v9089_v42 }
 0x1c7   : > { %8091 = vmatprep.subr.mxu0 %v9089_v42 }
 0x1c8   : > { %8074 = vmatmul.mubr.msk.f32.vlgmr.msra.gmra.mrb[34].mxu1 %vm953_vm1, %v1101_v47  ;;  %8084 = vmatmul.mubr.msk.f32.vlgmr.msra.gmra.mrb[24].mxu0 %vm953_vm1, %v1176_v51 }
 0x1c9   : > { %8077 = vmatpush3.xpose.msk.msra.mxu1 %vm953_vm1, %v7884_v55  ;;  %8092 = vmatpush3.xpose.msk.msra.mxu0 %vm953_vm1, %v1926_v60  ;;  %v7972_v14 = vpop.f32.mrb[14].mxu0 }
 0x1ca   : > { %8078 = vmatprep.mubr.msk.f32.mxu1 %vm9090_vm2, %v9089_v42  ;;  %8093 = vmatprep.mubr.msk.f32.mxu0 %vm9090_vm2, %v9089_v42  ;;  %v2376_v16 = vpop.f32.mrb[15].mxu0 }
 0x1cb   : > { %v7917_v8 = vpop.f32.mrb[16].mxu1  ;;  %8086 = vmatprep.subr.mxu1 %v9089_v42  ;;  %8101 = vmatprep.subr.mxu0 %v9089_v42 }
 0x1cc   : > { %v2001_v9 = vpop.f32.mrb[17].mxu1  ;;  %8079 = vmatmul.mubr.msk.f32.vlgmr.msra.gmra.mrb[36].mxu1 %vm953_vm1, %v7785_v46  ;;  %8094 = vmatmul.mubr.msk.f32.vlgmr.msra.gmra.mrb[26].mxu0 %vm953_vm1, %v1251_v54 }
 0x1cd   : > { %8087 = vmatpush3.xpose.msk.msra.mxu1 %vm953_vm1, %v7895_v5  ;;  %8102 = vmatpush3.xpose.msk.msra.mxu0 %vm953_vm1, %v2001_v9 }
 0x1ce   : > { %8088 = vmatprep.mubr.msk.f32.mxu1 %vm9090_vm2, %v9089_v42  ;;  %8103 = vmatprep.mubr.msk.f32.mxu0 %vm9090_vm2, %v9089_v42 }
 0x1cf   : > { %8096 = vmatprep.subr.mxu1 %v9089_v42  ;;  %8111 = vmatprep.subr.mxu0 %v9089_v42 }
 0x1d0   : > { %8089 = vmatmul.mubr.msk.f32.vlgmr.msra.gmra.mrb[38].mxu1 %vm953_vm1, %v7796_v50  ;;  %8104 = vmatmul.mubr.msk.f32.vlgmr.msra.gmra.mrb[28].mxu0 %vm953_vm1, %v1326_v45 }
 0x1d1   : > { %8097 = vmatpush3.xpose.msk.msra.mxu1 %vm953_vm1, %v7906_v59  ;;  %8112 = vmatpush3.xpose.msk.msra.mxu0 %vm953_vm1, %v2076_v0  ;;  %v9825_v21 = vpop.f32.mrb[16].mxu0 }
 0x1d2   : > { %8098 = vmatprep.mubr.msk.f32.mxu1 %vm9090_vm2, %v9089_v42  ;;  %8113 = vmatprep.mubr.msk.f32.mxu0 %vm9090_vm2, %v9089_v42  ;;  %v9827_v22 = vpop.f32.mrb[17].mxu0 }
 0x1d3   : > { %v7939_v10 = vpop.f32.mrb[18].mxu1  ;;  %8106 = vmatprep.subr.mxu1 %v9089_v42  ;;  %8121 = vmatprep.subr.mxu0 %v9089_v42 }
 0x1d4   : > { %v2151_v11 = vpop.f32.mrb[19].mxu1  ;;  %8099 = vmatmul.mubr.msk.f32.vlgmr.msra.gmra.mrb[40].mxu1 %vm953_vm1, %v7807_v19  ;;  %8114 = vmatmul.mubr.msk.f32.vlgmr.msra.gmra.mrb[30].mxu0 %vm953_vm1, %v1401_v58 }
 0x1d5   : > { %8107 = vmatpush3.xpose.msk.msra.mxu1 %vm953_vm1, %v7917_v8  ;;  %8122 = vmatpush3.xpose.msk.msra.mxu0 %vm953_vm1, %v2151_v11 }
 0x1d6   : > { %8108 = vmatprep.mubr.msk.f32.mxu1 %vm9090_vm2, %v9089_v42  ;;  %8123 = vmatprep.mubr.msk.f32.mxu0 %vm9090_vm2, %v9089_v42 }
 0x1d7   : > { %8116 = vmatprep.subr.mxu1 %v9089_v42  ;;  %8131 = vmatprep.subr.mxu0 %v9089_v42 }
 0x1d8   : > { %8109 = vmatmul.mubr.msk.f32.vlgmr.msra.gmra.mrb[42].mxu1 %vm953_vm1, %v9698_v7  ;;  %8124 = vmatmul.mubr.msk.f32.vlgmr.msra.gmra.mrb[32].mxu0 %vm953_vm1, %v9702_v49 }
 0x1d9   : > { %8117 = vmatpush3.xpose.msk.msra.mxu1 %vm953_vm1, %v7928_v63  ;;  %8132 = vmatpush3.xpose.msk.msra.mxu0 %vm953_vm1, %v2226_v4  ;;  %v9833_v25 = vpop.f32.mrb[18].mxu0 }
 0x1da   : > { %8118 = vmatprep.mubr.msk.f32.mxu1 %vm9090_vm2, %v9089_v42  ;;  %8133 = vmatprep.mubr.msk.f32.mxu0 %vm9090_vm2, %v9089_v42  ;;  %v9835_v26 = vpop.f32.mrb[19].mxu0 }
 0x1db   : > { %v7961_v12 = vpop.f32.mrb[20].mxu1  ;;  %8126 = vmatprep.subr.mxu1 %v9089_v42  ;;  %8141 = vmatprep.subr.mxu0 %v9089_v42 }
 0x1dc   : > { %v2301_v13 = vpop.f32.mrb[21].mxu1  ;;  %8119 = vmatmul.mubr.msk.f32.vlgmr.msra.gmra.mrb[44].mxu1 %vm953_vm1, %v9708_v57  ;;  %8134 = vmatmul.mubr.msk.f32.vlgmr.msra.gmra.mrb[34].mxu0 %vm953_vm1, %v9712_v62 }
 0x1dd   : > { %8127 = vmatpush3.xpose.msk.msra.mxu1 %vm953_vm1, %v7939_v10  ;;  %8142 = vmatpush3.xpose.msk.msra.mxu0 %vm953_vm1, %v2301_v13 }
 0x1de   : > { %8128 = vmatprep.mubr.msk.f32.mxu1 %vm9090_vm2, %v9089_v42  ;;  %8143 = vmatprep.mubr.msk.f32.mxu0 %vm9090_vm2, %v9089_v42 }
 0x1df   : > { %8136 = vmatprep.subr.mxu1 %v9089_v42  ;;  %8151 = vmatprep.subr.mxu0 %v9089_v42 }
 0x1e0   : > { %8129 = vmatmul.mubr.msk.f32.vlgmr.msra.gmra.mrb[46].mxu1 %vm953_vm1, %v9700_v48  ;;  %8144 = vmatmul.mubr.msk.f32.vlgmr.msra.gmra.mrb[36].mxu0 %vm953_vm1, %v9706_v53 }
 0x1e1   : > { %8137 = vmatpush3.xpose.msk.msra.mxu1 %vm953_vm1, %v9720_v3  ;;  %8138 = vmatprep.mubr.msk.f32.mxu1 %vm9090_vm2, %v9089_v42  ;;  %v9841_v29 = vpop.f32.mrb[20].mxu0 }
 0x1e2   : > { %8146 = vmatprep.subr.mxu1 %v9089_v42  ;;  %8153 = vmatprep.mubr.msk.f32.mxu0 %vm9090_vm2, %v9089_v42  ;;  %v9843_v30 = vpop.f32.mrb[21].mxu0 }
 0x1e3   : > { %v9815_v15 = vpop.f32.mrb[22].mxu1  ;;  %8152 = vmatpush3.msra.mxu0 %v2376_v16 }
 0x1e4   : > { %8139 = vmatmul.mubr.msk.f32.vlgmr.msra.gmra.mrb[48].mxu1 %vm953_vm1, %v9710_v61  ;;  %v9817_v17 = vpop.f32.mrb[23].mxu1  ;;  %8161 = vmatprep.subr.mxu0 %v9089_v42 }
 0x1e5   : > { %8147 = vmatpush3.xpose.msk.msra.mxu1 %vm953_vm1, %v7961_v12  ;;  %8148 = vmatprep.mubr.msk.f32.mxu1 %vm9090_vm2, %v9089_v42 }
 0x1e6   : > { %8156 = vmatprep.subr.mxu1 %v9089_v42 }
 0x1e8   : > { %8149 = vmatmul.mubr.msk.f32.vlgmr.msra.gmra.mrb[50].mxu1 %vm953_vm1, %v9704_v52 }
 0x1e9   : > { %8158 = vmatprep.mubr.msk.f32.mxu1 %vm9090_vm2, %v9089_v42  ;;  %8157 = vmatpush3.msra.mxu1 %v7972_v14  ;;  %v9845_v31 = vpop.f32.mrb[22].mxu0 }
 0x1ea   : > { %8166 = vmatprep.subr.mxu1 %v9089_v42  ;;  %v9847_v32 = vpop.f32.mrb[23].mxu0 }
 0x1eb   : > { %v9821_v18 = vpop.f32.mrb[24].mxu1 }
 0x1ec   : > { %v9823_v20 = vpop.f32.mrb[25].mxu1 }
 0x1f3   : > { %v9829_v23 = vpop.f32.mrb[26].mxu1 }
 0x1f4   : > { %v9831_v24 = vpop.f32.mrb[27].mxu1 }
 0x1fb   : > { %v9837_v27 = vpop.f32.mrb[28].mxu1 }
 0x1fc   : > { %v9839_v28 = vpop.f32.mrb[29].mxu1 }
 0x293   : > { %v9849_v33 = vpop.f32.mrb[30].mxu1 }
 0x294   : > { %v8065_v34 = vpop.f32.mrb[31].mxu1  ;;  %v4354_v35 = vsel %vm4353_vm3, %v9849_v33, -inf }
 0x295   : > { %4355 = vmax.xlane.f32.xlu0 %v4354_v35 }
 0x297   : > { %v9853_v36 = vpop.f32.mrb[32].mxu1 }
 0x298   : > { %v8070_v37 = vpop.f32.mrb[33].mxu1  ;;  %v4357_v38 = vsel %vm4353_vm3, %v9853_v36, -inf }
 0x299   : > { %4358 = vmax.xlane.f32.xlu0 %v4357_v38 }
 0x29b   : > { %v9857_v39 = vpop.f32.mrb[34].mxu1  ;;  %v9859_v40 = vpop.f32.mrb[24].mxu0 }
 0x29c   : > { %v8075_v41 = vpop.f32.mrb[35].mxu1  ;;  %v8085_v43 = vpop.f32.mrb[25].mxu0  ;;  %v4366_v44 = vsel %vm4353_vm3, %v9859_v40, -inf  ;;  %v4360_v7 = vsel %vm4353_vm3, %v9857_v39, -inf }
 0x29d   : > { %4367 = vmax.xlane.f32.xlu0 %v4366_v44  ;;  %4361 = vmax.xlane.f32.xlu1 %v4360_v7 }
 0x29f   : > { %v9865_v45 = vpop.f32.mrb[36].mxu1  ;;  %v9867_v46 = vpop.f32.mrb[26].mxu0 }
 0x2a0   : > { %v8080_v47 = vpop.f32.mrb[37].mxu1  ;;  %v8095_v48 = vpop.f32.mrb[27].mxu0  ;;  %v4372_v49 = vsel %vm4353_vm3, %v9867_v46, -inf  ;;  %v4363_v50 = vsel %vm4353_vm3, %v9865_v45, -inf }
 0x2a1   : > { %4373 = vmax.xlane.f32.xlu0 %v4372_v49  ;;  %4364 = vmax.xlane.f32.xlu1 %v4363_v50 }
 0x2a3   : > { %v9873_v51 = vpop.f32.mrb[38].mxu1  ;;  %v9875_v52 = vpop.f32.mrb[28].mxu0 }
 0x2a4   : > { %v8090_v53 = vpop.f32.mrb[39].mxu1  ;;  %v8105_v19 = vpop.f32.mrb[29].mxu0  ;;  %v4378_v54 = vsel %vm4353_vm3, %v9875_v52, -inf  ;;  %v4369_v55 = vsel %vm4353_vm3, %v9873_v51, -inf }
 0x2a5   : > { %4379 = vmax.xlane.f32.xlu0 %v4378_v54  ;;  %4370 = vmax.xlane.f32.xlu1 %v4369_v55 }
 0x2a7   : > { %v9881_v56 = vpop.f32.mrb[40].mxu1  ;;  %v9883_v57 = vpop.f32.mrb[30].mxu0 }
 0x2a8   : > { %v8100_v58 = vpop.f32.mrb[41].mxu1  ;;  %v8115_v59 = vpop.f32.mrb[31].mxu0  ;;  %v4384_v60 = vsel %vm4353_vm3, %v9883_v57, -inf  ;;  %v4375_v61 = vsel %vm4353_vm3, %v9881_v56, -inf }
 0x2a9   : > { %4385 = vmax.xlane.f32.xlu0 %v4384_v60  ;;  %4376 = vmax.xlane.f32.xlu1 %v4375_v61 }
 0x2ab   : > { %v9889_v62 = vpop.f32.mrb[42].mxu1  ;;  %v9891_v63 = vpop.f32.mrb[32].mxu0 }
 0x2ac   : > { %v8110_v0 = vpop.f32.mrb[43].mxu1  ;;  %v8125_v1 = vpop.f32.mrb[33].mxu0  ;;  %v4390_v2 = vsel %vm4353_vm3, %v9891_v63, -inf  ;;  %v4381_v3 = vsel %vm4353_vm3, %v9889_v62, -inf }
 0x2ad   : > { %4391 = vmax.xlane.f32.xlu0 %v4390_v2  ;;  %4382 = vmax.xlane.f32.xlu1 %v4381_v3 }
 0x2af   : > { %v9897_v4 = vpop.f32.mrb[44].mxu1  ;;  %v9899_v5 = vpop.f32.mrb[34].mxu0 }
 0x2b0   : > { %v8120_v6 = vpop.f32.mrb[45].mxu1  ;;  %v8135_v8 = vpop.f32.mrb[35].mxu0  ;;  %v4396_v9 = vsel %vm4353_vm3, %v9899_v5, -inf  ;;  %v4387_v10 = vsel %vm4353_vm3, %v9897_v4, -inf }
 0x2b1   : > { %4397 = vmax.xlane.f32.xlu0 %v4396_v9  ;;  %4388 = vmax.xlane.f32.xlu1 %v4387_v10 }
 0x2b3   : > { %v9905_v11 = vpop.f32.mrb[46].mxu1  ;;  %v9907_v12 = vpop.f32.mrb[36].mxu0 }
 0x2b4   : > { %v8130_v13 = vpop.f32.mrb[47].mxu1  ;;  %v8145_v14 = vpop.f32.mrb[37].mxu0  ;;  %v4402_v16 = vsel %vm4353_vm3, %v9907_v12, -inf  ;;  %v4393_v34 = vsel %vm4353_vm3, %v9905_v11, -inf }
 0x2b5   : > { %4403 = vmax.xlane.f32.xlu0 %v4402_v16  ;;  %4394 = vmax.xlane.f32.xlu1 %v4393_v34 }
 0x2b7   : > { %v9913_v35 = vpop.f32.mrb[48].mxu1 }
 0x2b8   : > { %v8140_v37 = vpop.f32.mrb[49].mxu1  ;;  %v4399_v38 = vsel %vm4353_vm3, %v9913_v35, -inf }
 0x2b9   : > { %4400 = vmax.xlane.f32.xlu1 %v4399_v38 }
 0x2bb   : > { %v9917_v41 = vpop.f32.mrb[50].mxu1 }
 0x2bc   : > { %v8150_v43 = vpop.f32.mrb[51].mxu1  ;;  %v4405_v44 = vsel %vm4353_vm3, %v9917_v41, -inf }
 0x2bd   : > { %4406 = vmax.xlane.f32.xlu1 %v4405_v44 }
 0x322   : > { %v4356_v7 = vpop.xlane.xlu0 %4355 }
 0x323   : > { %v4408_v47 = vsub.f32 %v9849_v33, %v4356_v7 }
 0x325   : > { %v4426_v48 = vmul.f32 1.442695, %v4408_v47 }
 0x326   : > { %v4359_v49 = vpop.xlane.xlu0 %4358 }
 0x327   : > { %8769 = vpow2.f32 %v4426_v48  ;;  %v4409_v50 = vsub.f32 %v9853_v36, %v4359_v49 }
 0x329   : > { %v4428_v53 = vmul.f32 1.442695, %v4409_v50 }
 0x32a   : > { %v4368_v19 = vpop.xlane.xlu0 %4367  ;;  %v4362_v54 = vpop.xlane.xlu1 %4361 }
 0x32b   : > { %8771 = vpow2.f32 %v4428_v53  ;;  %v4412_v55 = vsub.f32 %v9859_v40, %v4368_v19  ;;  %v4410_v58 = vsub.f32 %v9857_v39, %v4362_v54 }
 0x32d   : > { %v4430_v59 = vmul.f32 1.442695, %v4410_v58  ;;  %v4434_v60 = vmul.f32 1.442695, %v4412_v55 }
 0x32e   : > { %v4374_v61 = vpop.xlane.xlu0 %4373  ;;  %v4365_v0 = vpop.xlane.xlu1 %4364 }
 0x32f   : > { %v4414_v1 = vsub.f32 %v9867_v46, %v4374_v61  ;;  %v4411_v33 = vsub.f32 %v9865_v45, %v4365_v0  ;;  %8773 = vpow2.f32 %v4430_v59 }
 0x330   : > { %8775 = vpow2.f32 %v4434_v60 }
 0x331   : > { %v9927_v2 = vpop.eup %8769  ;;  %v4432_v36 = vmul.f32 1.442695, %v4411_v33  ;;  %v4438_v3 = vmul.f32 1.442695, %v4414_v1 }
 0x332   : > { %v4380_v6 = vpop.xlane.xlu0 %4379  ;;  %v4371_v8 = vpop.xlane.xlu1 %4370  ;;  %v4462_v40 = vsel %vm4353_vm3, %v9927_v2, 0.0 }
 0x333   : > { %v4416_v39 = vsub.f32 %v9875_v52, %v4380_v6  ;;  %v4413_v9 = vsub.f32 %v9873_v51, %v4371_v8  ;;  %4463 = vadd.xlane.f32.xlu0 %v4462_v40  ;;  %8777 = vpow2.f32 %v4432_v36 }
 0x334   : > { %8779 = vpow2.f32 %v4438_v3 }
 0x335   : > { %v9933_v46 = vpop.eup %8771  ;;  %v4436_v45 = vmul.f32 1.442695, %v4413_v9  ;;  %v4442_v10 = vmul.f32 1.442695, %v4416_v39 }
 0x336   : > { %v4386_v13 = vpop.xlane.xlu0 %4385  ;;  %v4377_v14 = vpop.xlane.xlu1 %4376  ;;  %v4465_v16 = vsel %vm4353_vm3, %v9933_v46, 0.0 }
 0x337   : > { %v4418_v34 = vsub.f32 %v9883_v57, %v4386_v13  ;;  %v4415_v37 = vsub.f32 %v9881_v56, %v4377_v14  ;;  %4466 = vadd.xlane.f32.xlu1 %v4465_v16  ;;  %8781 = vpow2.f32 %v4436_v45 }
 0x338   : > { %8783 = vpow2.f32 %v4442_v10 }
 0x339   : > { %v4440_v52 = vmul.f32 1.442695, %v4415_v37  ;;  %v9939_v51 = vpop.eup %8773  ;;  %v4446_v38 = vmul.f32 1.442695, %v4418_v34 }
 0x33a   : > { %v4392_v43 = vpop.xlane.xlu0 %4391  ;;  %v4383_v44 = vpop.xlane.xlu1 %4382  ;;  %v4468_v48 = vsel %vm4353_vm3, %v9939_v51, 0.0 }
 0x33b   : > { %v4420_v7 = vsub.f32 %v9891_v63, %v4392_v43  ;;  %v4417_v47 = vsub.f32 %v9889_v62, %v4383_v44  ;;  %v9945_v49 = vpop.eup %8775  ;;  %8785 = vpow2.f32 %v4440_v52  ;;  %4469 = vadd.xlane.f32.xlu0 %v4468_v48 }
 0x33c   : > { %8787 = vpow2.f32 %v4446_v38  ;;  %v4474_v62 = vsel %vm4353_vm3, %v9945_v49, 0.0 }
 0x33d   : > { %v4444_v56 = vmul.f32 1.442695, %v4417_v47  ;;  %v9947_v57 = vpop.eup %8777  ;;  %v4450_v50 = vmul.f32 1.442695, %v4420_v7 }
 0x33e   : > { %v4398_v53 = vpop.xlane.xlu0 %4397  ;;  %v4389_v19 = vpop.xlane.xlu1 %4388  ;;  %v4471_v55 = vsel %vm4353_vm3, %v9947_v57, 0.0 }
 0x33f   : > { %v4422_v54 = vsub.f32 %v9899_v5, %v4398_v53  ;;  %v4419_v63 = vsub.f32 %v9897_v4, %v4389_v19  ;;  %v9955_v58 = vpop.eup %8779  ;;  %8789 = vpow2.f32 %v4444_v56  ;;  %4475 = vadd.xlane.f32.xlu0 %v4474_v62  ;;  %4472 = vadd.xlane.f32.xlu1 %v4471_v55 }
 0x340   : > { %8791 = vpow2.f32 %v4450_v50  ;;  %v4480_v33 = vsel %vm4353_vm3, %v9955_v58, 0.0 }
 0x341   : > { %v4448_v59 = vmul.f32 1.442695, %v4419_v63  ;;  %v9957_v60 = vpop.eup %8781  ;;  %v4454_v61 = vmul.f32 1.442695, %v4422_v54 }
 0x342   : > { %v4404_v0 = vpop.xlane.xlu0 %4403  ;;  %v4395_v5 = vpop.xlane.xlu1 %4394  ;;  %v4477_v36 = vsel %vm4353_vm3, %v9957_v60, 0.0 }
 0x343   : > { %v4424_v4 = vsub.f32 %v9907_v12, %v4404_v0  ;;  %v4421_v1 = vsub.f32 %v9905_v11, %v4395_v5  ;;  %v9965_v3 = vpop.eup %8783  ;;  %8793 = vpow2.f32 %v4448_v59  ;;  %4481 = vadd.xlane.f32.xlu0 %v4480_v33  ;;  %4478 = vadd.xlane.f32.xlu1 %v4477_v36 }
 0x344   : > { %8795 = vpow2.f32 %v4454_v61  ;;  %v4486_v11 = vsel %vm4353_vm3, %v9965_v3, 0.0 }
 0x345   : > { %v4452_v6 = vmul.f32 1.442695, %v4421_v1  ;;  %v9967_v8 = vpop.eup %8785  ;;  %v4458_v40 = vmul.f32 1.442695, %v4424_v4 }
 0x346   : > { %v4401_v39 = vpop.xlane.xlu1 %4400  ;;  %v4483_v9 = vsel %vm4353_vm3, %v9967_v8, 0.0  ;;  %v9974_v45 = vpop.eup %8787 }
 0x347   : > { %v4423_v12 = vsub.f32 %v9913_v35, %v4401_v39  ;;  %8797 = vpow2.f32 %v4452_v6  ;;  %4487 = vadd.xlane.f32.xlu0 %v4486_v11  ;;  %4484 = vadd.xlane.f32.xlu1 %v4483_v9  ;;  %v4492_v35 = vsel %vm4353_vm3, %v9974_v45, 0.0 }
 0x348   : > { %8799 = vpow2.f32 %v4458_v40 }
 0x349   : > { %v4456_v10 = vmul.f32 1.442695, %v4423_v12  ;;  %v9976_v13 = vpop.eup %8789 }
 0x34a   : > { %v4407_v14 = vpop.xlane.xlu1 %4406  ;;  %v4489_v34 = vsel %vm4353_vm3, %v9976_v13, 0.0  ;;  %v9983_v37 = vpop.eup %8791 }
 0x34b   : > { %8801 = vpow2.f32 %v4456_v10  ;;  %v4425_v16 = vsub.f32 %v9917_v41, %v4407_v14  ;;  %4493 = vadd.xlane.f32.xlu0 %v4492_v35  ;;  %4490 = vadd.xlane.f32.xlu1 %v4489_v34  ;;  %v4498_v43 = vsel %vm4353_vm3, %v9983_v37, 0.0 }
 0x34d   : > { %v4460_v52 = vmul.f32 1.442695, %v4425_v16  ;;  %v9985_v38 = vpop.eup %8793 }
 0x34e   : > { %v4495_v41 = vsel %vm4353_vm3, %v9985_v38, 0.0  ;;  %v9991_v44 = vpop.eup %8795 }
 0x34f   : > { %8803 = vpow2.f32 %v4460_v52  ;;  %4499 = vadd.xlane.f32.xlu0 %v4498_v43  ;;  %4496 = vadd.xlane.f32.xlu1 %v4495_v41  ;;  %v4504_v47 = vsel %vm4353_vm3, %v9991_v44, 0.0 }
 0x351   : > { %v9993_v7 = vpop.eup %8797 }
 0x352   : > { %v4501_v48 = vsel %vm4353_vm3, %v9993_v7, 0.0  ;;  %v9999_v56 = vpop.eup %8799 }
 0x353   : > { %4505 = vadd.xlane.f32.xlu0 %v4504_v47  ;;  %4502 = vadd.xlane.f32.xlu1 %v4501_v48  ;;  %v4510_v19 = vsel %vm4353_vm3, %v9999_v56, 0.0 }
 0x355   : > { %v10001_v50 = vpop.eup %8801 }
 0x356   : > { %v4507_v53 = vsel %vm4353_vm3, %v10001_v50, 0.0 }
 0x357   : > { %4511 = vadd.xlane.f32.xlu0 %v4510_v19  ;;  %4508 = vadd.xlane.f32.xlu1 %v4507_v53 }
 0x359   : > { %v10007_v54 = vpop.eup %8803 }
 0x35a   : > { %v4513_v63 = vsel %vm4353_vm3, %v10007_v54, 0.0 }
 0x35b   : > { %4514 = vadd.xlane.f32.xlu1 %v4513_v63  ;;  %v921_v63 = vld [vmem:[%s9417_s2 + $0x20] sm:$0xff] }
 0x3c0   : > { %v4464_v62 = vpop.xlane.xlu0 %4463 }
 0x3c1   : > { %8805 = vrcp.f32 %v4464_v62  ;;  %v922_v62 = vld [vmem:[%s9417_s2 + $0x28] sm:$0xff] }
 0x3c4   : > { %v4467_v55 = vpop.xlane.xlu1 %4466 }
 0x3c5   : > { %8807 = vrcp.f32 %v4467_v55  ;;  %v8575_v55 = vpack.c.bf16 %v922_v62, %v921_v63  ;;  %v950_v63 = vld [vmem:[%s9417_s2 + $0x108] sm:$0xff] }
 0x3c8   : > { %v4470_v59 = vpop.xlane.xlu0 %4469 }
 0x3c9   : > { %8809 = vrcp.f32 %v4470_v59  ;;  %v925_v59 = vld [vmem:[%s9417_s2 + $0x40] sm:$0xff] }
 0x3cb   : > { %v8806_v61 = vpop.eup %8805 }
 0x3cc   : > { %v4534_v0 = vmul.f32 %v8806_v61, %v9927_v2  ;;  %v4476_v5 = vpop.xlane.xlu0 %4475  ;;  %v4473_v4 = vpop.xlane.xlu1 %4472 }
 0x3cd   : > { %8811 = vrcp.f32 %v4476_v5 }
 0x3ce   : > { %8154 = vmatmul.mubr.msk.f32.vlgmr.msra.gmra.mrb[38].mxu0 %vm4353_vm3, %v4534_v0  ;;  %8813 = vrcp.f32 %v4473_v4  ;;  %v926_v0 = vld [vmem:[%s9417_s2 + $0x48] sm:$0xff]  ;;  %v929_v4 = vld [vmem:[%s9417_s2 + $0x60] sm:$0xff] }
 0x3cf   : > { %v8808_v1 = vpop.eup %8807  ;;  %8162 = vmatpush3.msra.mxu0 %v9817_v17  ;;  %8163 = vmatprep.mubr.msk.f32.mxu0 %vm9090_vm2, %v9089_v42  ;;  %v8583_v5 = vpack.c.bf16 %v926_v0, %v925_v59  ;;  %v951_v0 = vld [vmem:[%s9417_s2 + $0x110] sm:$0xff] }
 0x3d0   : > { %v4535_v33 = vmul.f32 %v8808_v1, %v9933_v46  ;;  %8171 = vmatprep.subr.mxu0 %v9089_v42  ;;  %v4482_v36 = vpop.xlane.xlu0 %4481  ;;  %v4479_v6 = vpop.xlane.xlu1 %4478  ;;  %v930_v1 = vld [vmem:[%s9417_s2 + $0x68] sm:$0xff] }
 0x3d1   : > { %8815 = vrcp.f32 %v4482_v36 }
 0x3d2   : > { %8159 = vmatmul.mubr.msk.f32.vlgmr.msra.gmra.mrb[52].mxu1 %vm4353_vm3, %v4535_v33  ;;  %8817 = vrcp.f32 %v4479_v6  ;;  %v8591_v33 = vpack.c.bf16 %v930_v1, %v929_v4  ;;  %v927_v6 = vld [vmem:[%s9417_s2 + $0x50] sm:$0xff] }
 0x3d3   : > { %8167 = vmatpush3.msra.mxu1 %v9815_v15  ;;  %8168 = vmatprep.mubr.msk.f32.mxu1 %vm9090_vm2, %v9089_v42  ;;  %v8810_v2 = vpop.eup %8809 }
 0x3d4   : > { %8176 = vmatprep.subr.mxu1 %v9089_v42  ;;  %v4536_v17 = vmul.f32 %v8810_v2, %v9939_v51  ;;  %v4488_v40 = vpop.xlane.xlu0 %4487  ;;  %v4485_v46 = vpop.xlane.xlu1 %4484  ;;  %v928_v2 = vld [vmem:[%s9417_s2 + $0x58] sm:$0xff] }
 0x3d5   : > { %8819 = vrcp.f32 %v4488_v40  ;;  %v8587_v40 = vpack.c.bf16 %v928_v2, %v927_v6 }
 0x3d6   : > { %8821 = vrcp.f32 %v4485_v46  ;;  %8164 = vmatmul.mubr.msk.f32.vlgmr.msra.gmra.mrb[40].mxu0 %vm4353_vm3, %v4536_v17 }
 0x3d7   : > { %v8812_v39 = vpop.eup %8811  ;;  %8172 = vmatpush3.msra.mxu0 %v9827_v22  ;;  %8173 = vmatprep.mubr.msk.f32.mxu0 %vm9090_vm2, %v9089_v42 }
 0x3d8   : > { %v8814_v15 = vpop.eup %8813  ;;  %v4538_v12 = vmul.f32 %v8812_v39, %v9945_v49  ;;  %v4494_v11 = vpop.xlane.xlu0 %4493  ;;  %8181 = vmatprep.subr.mxu0 %v9089_v42  ;;  %v933_v39 = vld [vmem:[%s9417_s2 + $0x80] sm:$0xff] }
 0x3d9   : > { %v4491_v9 = vpop.xlane.xlu1 %4490  ;;  %v4537_v51 = vmul.f32 %v8814_v15, %v9947_v57  ;;  %8823 = vrcp.f32 %v4494_v11  ;;  %v934_v15 = vld [vmem:[%s9417_s2 + $0x88] sm:$0xff] }
 0x3da   : > { %8825 = vrcp.f32 %v4491_v9  ;;  %8174 = vmatmul.mubr.msk.f32.vlgmr.msra.gmra.mrb[42].mxu0 %vm4353_vm3, %v4538_v12  ;;  %v8599_v11 = vpack.c.bf16 %v934_v15, %v933_v39 }
 0x3db   : > { %v8816_v10 = vpop.eup %8815  ;;  %8169 = vmatmul.mubr.msk.f32.vlgmr.msra.gmra.mrb[54].mxu1 %vm4353_vm3, %v4537_v51  ;;  %8182 = vmatpush3.msra.mxu0 %v9823_v20 }
 0x3dc   : > { %v8818_v22 = vpop.eup %8817  ;;  %v4540_v14 = vmul.f32 %v8816_v10, %v9955_v58  ;;  %8177 = vmatpush3.msra.mxu1 %v9825_v21  ;;  %v4500_v49 = vpop.xlane.xlu0 %4499  ;;  %8178 = vmatprep.mubr.msk.f32.mxu1 %vm9090_vm2, %v9089_v42  ;;  %v931_v10 = vld [vmem:[%s9417_s2 + $0x70] sm:$0xff] }
 0x3dd   : > { %v4497_v16 = vpop.xlane.xlu1 %4496  ;;  %v4539_v57 = vmul.f32 %v8818_v22, %v9957_v60  ;;  %8827 = vrcp.f32 %v4500_v49  ;;  %8183 = vmatprep.mubr.msk.f32.mxu0 %vm9090_vm2, %v9089_v42  ;;  %8186 = vmatprep.subr.mxu1 %v9089_v42  ;;  %v932_v22 = vld [vmem:[%s9417_s2 + $0x78] sm:$0xff] }
 0x3de   : > { %8829 = vrcp.f32 %v4497_v16  ;;  %8191 = vmatprep.subr.mxu0 %v9089_v42  ;;  %8184 = vmatmul.mubr.msk.f32.vlgmr.msra.gmra.mrb[44].mxu0 %vm4353_vm3, %v4540_v14  ;;  %v8595_v49 = vpack.c.bf16 %v932_v22, %v931_v10  ;;  %v935_v16 = vld [vmem:[%s9417_s2 + $0x90] sm:$0xff] }
 0x3df   : > { %v8820_v20 = vpop.eup %8819  ;;  %8179 = vmatmul.mubr.msk.f32.vlgmr.msra.gmra.mrb[56].mxu1 %vm4353_vm3, %v4539_v57  ;;  %8192 = vmatpush3.msra.mxu0 %v9835_v26 }
 0x3e0   : > { %v8822_v21 = vpop.eup %8821  ;;  %v4542_v58 = vmul.f32 %v8820_v20, %v9965_v3  ;;  %8187 = vmatpush3.msra.mxu1 %v9821_v18  ;;  %v4506_v60 = vpop.xlane.xlu0 %4505  ;;  %8188 = vmatprep.mubr.msk.f32.mxu1 %vm9090_vm2, %v9089_v42 }
 0x3e1   : > { %v4503_v35 = vpop.xlane.xlu1 %4502  ;;  %v4541_v34 = vmul.f32 %v8822_v21, %v9967_v8  ;;  %8831 = vrcp.f32 %v4506_v60  ;;  %8193 = vmatprep.mubr.msk.f32.mxu0 %vm9090_vm2, %v9089_v42  ;;  %8196 = vmatprep.subr.mxu1 %v9089_v42  ;;  %v936_v21 = vld [vmem:[%s9417_s2 + $0x98] sm:$0xff]  ;;  %v938_v60 = vld [vmem:[%s9417_s2 + $0xa8] sm:$0xff] }
 0x3e2   : > { %8833 = vrcp.f32 %v4503_v35  ;;  %8201 = vmatprep.subr.mxu0 %v9089_v42  ;;  %8194 = vmatmul.mubr.msk.f32.vlgmr.msra.gmra.mrb[46].mxu0 %vm4353_vm3, %v4542_v58  ;;  %v937_v58 = vld [vmem:[%s9417_s2 + $0xa0] sm:$0xff] }
 0x3e3   : > { %v8824_v26 = vpop.eup %8823  ;;  %8189 = vmatmul.mubr.msk.f32.vlgmr.msra.gmra.mrb[58].mxu1 %vm4353_vm3, %v4541_v34  ;;  %8202 = vmatpush3.msra.mxu0 %v9831_v24 }
 0x3e4   : > { %v8826_v18 = vpop.eup %8825  ;;  %v4544_v3 = vmul.f32 %v8824_v26, %v9974_v45  ;;  %8197 = vmatpush3.msra.mxu1 %v9833_v25  ;;  %v4512_v8 = vpop.xlane.xlu0 %4511  ;;  %8198 = vmatprep.mubr.msk.f32.mxu1 %vm9090_vm2, %v9089_v42  ;;  %v8603_v26 = vpack.c.bf16 %v936_v21, %v935_v16 }
 0x3e5   : > { %v4509_v52 = vpop.xlane.xlu1 %4508  ;;  %v4543_v43 = vmul.f32 %v8826_v18, %v9976_v13  ;;  %8835 = vrcp.f32 %v4512_v8  ;;  %8203 = vmatprep.mubr.msk.f32.mxu0 %vm9090_vm2, %v9089_v42  ;;  %8206 = vmatprep.subr.mxu1 %v9089_v42  ;;  %v8607_v18 = vpack.c.bf16 %v938_v60, %v937_v58 }
 0x3e6   : > { %8837 = vrcp.f32 %v4509_v52  ;;  %8211 = vmatprep.subr.mxu0 %v9089_v42  ;;  %8204 = vmatmul.mubr.msk.f32.vlgmr.msra.gmra.mrb[48].mxu0 %vm4353_vm3, %v4544_v3  ;;  %v939_v3 = vld [vmem:[%s9417_s2 + $0xb0] sm:$0xff] }
 0x3e7   : > { %v8828_v24 = vpop.eup %8827  ;;  %8199 = vmatmul.mubr.msk.f32.vlgmr.msra.gmra.mrb[60].mxu1 %vm4353_vm3, %v4543_v43  ;;  %8212 = vmatpush3.msra.mxu0 %v9843_v30  ;;  %v940_v43 = vld [vmem:[%s9417_s2 + $0xb8] sm:$0xff] }
 0x3e8   : > { %v8830_v25 = vpop.eup %8829  ;;  %v4546_v45 = vmul.f32 %v8828_v24, %v9983_v37  ;;  %8207 = vmatpush3.msra.mxu1 %v9829_v23  ;;  %8208 = vmatprep.mubr.msk.f32.mxu1 %vm9090_vm2, %v9089_v42  ;;  %v917_v23 = vld [vmem:[%s9417_s2] sm:$0xff]  ;;  %v918_v37 = vld [vmem:[%s9417_s2 + $0x8] sm:$0xff] }
 0x3e9   : > { %v4515_v13 = vpop.xlane.xlu1 %4514  ;;  %v4545_v41 = vmul.f32 %v8830_v25, %v9985_v38  ;;  %8213 = vmatprep.mubr.msk.f32.mxu0 %vm9090_vm2, %v9089_v42  ;;  %8216 = vmatprep.subr.mxu1 %v9089_v42  ;;  %v941_v24 = vld [vmem:[%s9417_s2 + $0xc0] sm:$0xff]  ;;  %v942_v25 = vld [vmem:[%s9417_s2 + $0xc8] sm:$0xff] }
 0x3ea   : > { %8839 = vrcp.f32 %v4515_v13  ;;  %8221 = vmatprep.subr.mxu0 %v9089_v42  ;;  %8214 = vmatmul.mubr.msk.f32.vlgmr.msra.gmra.mrb[50].mxu0 %vm4353_vm3, %v4546_v45 }
 0x3eb   : > { %v8832_v30 = vpop.eup %8831  ;;  %8209 = vmatmul.mubr.msk.f32.vlgmr.msra.gmra.mrb[62].mxu1 %vm4353_vm3, %v4545_v41  ;;  %8222 = vmatpush3.msra.mxu0 %v9839_v28  ;;  %v8567_v28 = vpack.c.bf16 %v918_v37, %v917_v23  ;;  %v8611_v41 = vpack.c.bf16 %v940_v43, %v939_v3  ;;  %v943_v23 = vld [vmem:[%s9417_s2 + $0xd0] sm:$0xff] }
 0x3ec   : > { %v8834_v47 = vpop.eup %8833  ;;  %v4548_v38 = vmul.f32 %v8832_v30, %v9991_v44  ;;  %8217 = vmatpush3.msra.mxu1 %v9841_v29  ;;  %8218 = vmatprep.mubr.msk.f32.mxu1 %vm9090_vm2, %v9089_v42  ;;  %v8615_v30 = vpack.c.bf16 %v942_v25, %v941_v24 }
 0x3ed   : > { %v4547_v48 = vmul.f32 %v8834_v47, %v9993_v7  ;;  %8223 = vmatprep.mubr.msk.f32.mxu0 %vm9090_vm2, %v9089_v42  ;;  %8226 = vmatprep.subr.mxu1 %v9089_v42 }
 0x3ee   : > { %8231 = vmatprep.subr.mxu0 %v9089_v42  ;;  %8224 = vmatmul.mubr.msk.f32.vlgmr.msra.gmra.mrb[52].mxu0 %vm4353_vm3, %v4548_v38  ;;  %v944_v38 = vld [vmem:[%s9417_s2 + $0xd8] sm:$0xff] }
 0x3ef   : > { %v8836_v53 = vpop.eup %8835  ;;  %8219 = vmatmul.mubr.msk.f32.vlgmr.msra.gmra.mrb[64].mxu1 %vm4353_vm3, %v4547_v48  ;;  %8232 = vmatpush3.msra.mxu0 %v9847_v32  ;;  %v945_v48 = vld [vmem:[%s9417_s2 + $0xe0] sm:$0xff] }
 0x3f0   : > { %v8838_v29 = vpop.eup %8837  ;;  %v4550_v44 = vmul.f32 %v8836_v53, %v9999_v56  ;;  %8227 = vmatpush3.msra.mxu1 %v9837_v27  ;;  %8228 = vmatprep.mubr.msk.f32.mxu1 %vm9090_vm2, %v9089_v42  ;;  %v919_v56 = vld [vmem:[%s9417_s2 + $0x10] sm:$0xff] }
 0x3f1   : > { %v4549_v7 = vmul.f32 %v8838_v29, %v10001_v50  ;;  %8233 = vmatprep.mubr.msk.f32.mxu0 %vm9090_vm2, %v9089_v42  ;;  %8236 = vmatprep.subr.mxu1 %v9089_v42  ;;  %v920_v50 = vld [vmem:[%s9417_s2 + $0x18] sm:$0xff] }
 0x3f2   : > { %8234 = vmatmul.mubr.msk.f32.vlgmr.msra.gmra.mrb[54].mxu0 %vm4353_vm3, %v4550_v44  ;;  %8568 = vmatprep.subr.bf16.mxu0 %v8567_v28  ;;  %v8571_v19 = vpack.c.bf16 %v920_v50, %v919_v56  ;;  %v8619_v44 = vpack.c.bf16 %v944_v38, %v943_v23  ;;  %v948_v50 = vld [vmem:[%s9417_s2 + $0xf8] sm:$0xff] }
 0x3f3   : > { %8229 = vmatmul.mubr.msk.f32.vlgmr.msra.gmra.mrb[66].mxu1 %vm4353_vm3, %v4549_v7  ;;  %8570 = vmatpush3.bf16.msra.mxu0 %v8567_v28  ;;  %v946_v28 = vld [vmem:[%s9417_s2 + $0xe8] sm:$0xff] }
 0x3f4   : > { %v8840_v32 = vpop.eup %8839  ;;  %8237 = vmatpush3.msra.mxu1 %v9845_v31  ;;  %8238 = vmatprep.mubr.msk.f32.mxu1 %vm9090_vm2, %v9089_v42  ;;  %v923_v31 = vld [vmem:[%s9417_s2 + $0x30] sm:$0xff]  ;;  %v8623_v7 = vpack.c.bf16 %v946_v28, %v945_v48 }
 0x3f5   : > { %v4551_v27 = vmul.f32 %v8840_v32, %v10007_v54  ;;  %8572 = vmatprep.subr.bf16.mxu0 %v8571_v19  ;;  %8576 = vmatprep.subr.bf16.mxu1 %v8575_v55  ;;  %v924_v54 = vld [vmem:[%s9417_s2 + $0x38] sm:$0xff]  ;;  %v947_v32 = vld [vmem:[%s9417_s2 + $0xf0] sm:$0xff] }
 0x3f6   : > { %v8579_v61 = vpack.c.bf16 %v924_v54, %v923_v31  ;;  %v8627_v31 = vpack.c.bf16 %v948_v50, %v947_v32 }
 0x3f7   : > { %8239 = vmatmul.mubr.msk.f32.vlgmr.msra.gmra.mrb[68].mxu1 %vm4353_vm3, %v4551_v27  ;;  %8574 = vmatpush3.bf16.msra.mxu0 %v8571_v19  ;;  %v949_v19 = vld [vmem:[%s9417_s2 + $0x100] sm:$0xff] }
 0x3f8   : > { %8578 = vmatpush3.bf16.msra.mxu1 %v8575_v55  ;;  %8584 = vmatprep.subr.bf16.mxu0 %v8583_v5  ;;  %v8631_v54 = vpack.c.bf16 %v950_v63, %v949_v19 }
 0x3f9   : > { %8580 = vmatprep.subr.bf16.mxu1 %v8579_v61 }
 0x3fc   : > { %8582 = vmatpush3.bf16.msra.mxu1 %v8579_v61 }
 0x3fd   : > { %8592 = vmatprep.subr.bf16.mxu1 %v8591_v33 }
 0x4a1   : > { %v4621_v36 = vpop.f32.mrb[38].mxu0 }
 0x4a2   : > { %v8155_v17 = vpop.f32.mrb[39].mxu0  ;;  %8249 = vmatprep.mubr.msk.f32.mxu0 %vm953_vm1, %v4621_v36 }
 0x4a5   : > { %v4694_v46 = vpop.f32.mrb[52].mxu1 }
 0x4a6   : > { %v8160_v12 = vpop.f32.mrb[53].mxu1  ;;  %8250 = vmatmul.mubr.msk.f32.vlgmr.msra.gmra.mrb[56].mxu0 %vm953_vm1, %v4694_v46 }
 0x4a7   : > { %8586 = vmatpush3.bf16.msra.mxu0 %v8583_v5  ;;  %v952_v5 = vld [vmem:[%s9417_s2 + $0x118] sm:$0xff] }
 0x4a8   : > { %8588 = vmatprep.subr.bf16.mxu0 %v8587_v40 }
 0x4a9   : > { %v4767_v9 = vpop.f32.mrb[40].mxu0 }
 0x4aa   : > { %v8165_v51 = vpop.f32.mrb[41].mxu0  ;;  %8260 = vmatprep.mubr.msk.f32.mxu1 %vm953_vm1, %v4767_v9 }
 0x4ab   : > { %8590 = vmatpush3.bf16.msra.mxu0 %v8587_v40 }
 0x4ac   : > { %8600 = vmatprep.subr.bf16.mxu0 %v8599_v11 }
 0x4ad   : > { %v4913_v14 = vpop.f32.mrb[42].mxu0 }
 0x4ae   : > { %v4840_v57 = vpop.f32.mrb[54].mxu1  ;;  %v8175_v20 = vpop.f32.mrb[43].mxu0  ;;  %8271 = vmatprep.mubr.msk.f32.mxu0 %vm953_vm1, %v4913_v14 }
 0x4af   : > { %v8170_v35 = vpop.f32.mrb[55].mxu1  ;;  %8261 = vmatmul.mubr.msk.f32.vlgmr.msra.gmra.mrb[70].mxu1 %vm953_vm1, %v4840_v57 }
 0x4b0   : > { %8594 = vmatpush3.bf16.msra.mxu1 %v8591_v33  ;;  %v8635_v33 = vpack.c.bf16 %v952_v5, %v951_v0 }
 0x4b1   : > { %v5059_v34 = vpop.f32.mrb[44].mxu0  ;;  %8596 = vmatprep.subr.bf16.mxu1 %v8595_v49 }
 0x4b2   : > { %v4986_v8 = vpop.f32.mrb[56].mxu1  ;;  %v8185_v52 = vpop.f32.mrb[45].mxu0  ;;  %8282 = vmatprep.mubr.msk.f32.mxu1 %vm953_vm1, %v5059_v34 }
 0x4b3   : > { %v8180_v45 = vpop.f32.mrb[57].mxu1  ;;  %8272 = vmatmul.mubr.msk.f32.vlgmr.msra.gmra.mrb[58].mxu0 %vm953_vm1, %v4986_v8 }
 0x4b4   : > { %8598 = vmatpush3.bf16.msra.mxu1 %v8595_v49  ;;  %8602 = vmatpush3.bf16.msra.mxu0 %v8599_v11 }
 0x4b5   : > { %v5205_v13 = vpop.f32.mrb[46].mxu0  ;;  %8604 = vmatprep.subr.bf16.mxu0 %v8603_v26  ;;  %8608 = vmatprep.subr.bf16.mxu1 %v8607_v18 }
 0x4b6   : > { %v5132_v37 = vpop.f32.mrb[58].mxu1  ;;  %v8195_v47 = vpop.f32.mrb[47].mxu0  ;;  %8293 = vmatprep.mubr.msk.f32.mxu0 %vm953_vm1, %v5205_v13 }
 0x4b7   : > { %v8190_v53 = vpop.f32.mrb[59].mxu1  ;;  %8283 = vmatmul.mubr.msk.f32.vlgmr.msra.gmra.mrb[72].mxu1 %vm953_vm1, %v5132_v37 }
 0x4b8   : > { %8606 = vmatpush3.bf16.msra.mxu0 %v8603_v26  ;;  %8610 = vmatpush3.bf16.msra.mxu1 %v8607_v18 }
 0x4b9   : > { %v5351_v29 = vpop.f32.mrb[48].mxu0  ;;  %8612 = vmatprep.subr.bf16.mxu1 %v8611_v41  ;;  %8616 = vmatprep.subr.bf16.mxu0 %v8615_v30 }
 0x4ba   : > { %v5278_v27 = vpop.f32.mrb[60].mxu1  ;;  %v8205_v56 = vpop.f32.mrb[49].mxu0  ;;  %8304 = vmatprep.mubr.msk.f32.mxu1 %vm953_vm1, %v5351_v29 }
 0x4bb   : > { %v8200_v62 = vpop.f32.mrb[61].mxu1  ;;  %8294 = vmatmul.mubr.msk.f32.vlgmr.msra.gmra.mrb[60].mxu0 %vm953_vm1, %v5278_v27 }
 0x4bc   : > { %8614 = vmatpush3.bf16.msra.mxu1 %v8611_v41  ;;  %8618 = vmatpush3.bf16.msra.mxu0 %v8615_v30 }
 0x4bd   : > { %v5497_v55 = vpop.f32.mrb[50].mxu0  ;;  %8620 = vmatprep.subr.bf16.mxu0 %v8619_v44  ;;  %8624 = vmatprep.subr.bf16.mxu1 %v8623_v7 }
 0x4be   : > { %v5424_v59 = vpop.f32.mrb[62].mxu1  ;;  %v8215_v61 = vpop.f32.mrb[51].mxu0  ;;  %8315 = vmatprep.mubr.msk.f32.mxu0 %vm953_vm1, %v5497_v55 }
 0x4bf   : > { %v8210_v4 = vpop.f32.mrb[63].mxu1  ;;  %8305 = vmatmul.mubr.msk.f32.vlgmr.msra.gmra.mrb[74].mxu1 %vm953_vm1, %v5424_v59 }
 0x4c0   : > { %8622 = vmatpush3.bf16.msra.mxu0 %v8619_v44  ;;  %8626 = vmatpush3.bf16.msra.mxu1 %v8623_v7 }
 0x4c1   : > { %v5643_v1 = vpop.f32.mrb[52].mxu0  ;;  %8628 = vmatprep.subr.bf16.mxu1 %v8627_v31  ;;  %8632 = vmatprep.subr.bf16.mxu0 %v8631_v54 }
 0x4c2   : > { %v5570_v36 = vpop.f32.mrb[64].mxu1  ;;  %v8225_v6 = vpop.f32.mrb[53].mxu0  ;;  %8326 = vmatprep.mubr.msk.f32.mxu1 %vm953_vm1, %v5643_v1  ;;  %v8849_v1 = vld [vmem:[#allocation2 + $0x8] sm:$0xff] }
 0x4c3   : > { %v8220_v2 = vpop.f32.mrb[65].mxu1  ;;  %8316 = vmatmul.mubr.msk.f32.vlgmr.msra.gmra.mrb[62].mxu0 %vm953_vm1, %v5570_v36  ;;  %v8850_v36 = vld [vmem:[#allocation2] sm:$0xff] }
 0x4c4   : > { %8630 = vmatpush3.bf16.msra.mxu1 %v8627_v31  ;;  %8634 = vmatpush3.bf16.msra.mxu0 %v8631_v54 }
 0x4c5   : > { %v5789_v17 = vpop.f32.mrb[54].mxu0  ;;  %8636 = vmatprep.subr.bf16.mxu0 %v8635_v33 }
 0x4c6   : > { %v5716_v40 = vpop.f32.mrb[66].mxu1  ;;  %v8235_v46 = vpop.f32.mrb[55].mxu0  ;;  %8337 = vmatprep.mubr.msk.f32.mxu0 %vm953_vm1, %v5789_v17 }
 0x4c7   : > { %v8230_v39 = vpop.f32.mrb[67].mxu1  ;;  %8327 = vmatmul.mubr.msk.f32.vlgmr.msra.gmra.mrb[76].mxu1 %vm953_vm1, %v5716_v40 }
 0x4c8   : > { %8638 = vmatpush3.bf16.msra.mxu0 %v8635_v33  ;;  %6768 = vmatprep.mubr.f32.mxu1 %v9089_v42 }
 0x4ca   : > { %v5862_v15 = vpop.f32.mrb[68].mxu1 }
 0x4cb   : > { %v8240_v12 = vpop.f32.mrb[69].mxu1  ;;  %8338 = vmatmul.mubr.msk.f32.vlgmr.msra.gmra.mrb[64].mxu0 %vm953_vm1, %v5862_v15 }
 0x579   : > { %v8251_v11 = vpop.f32.mrb[56].mxu0 }
 0x57a   : > { %v5938_v9 = vpop.f32.mrb[57].mxu0  ;;  %v6612_v10 = vsel %vm953_vm1, %v8251_v11, 0.0 }
 0x57b   : > { %v6595_v49 = vsel %vm953_vm1, %v5938_v9, 0.0 }
 0x582   : > { %v8262_v51 = vpop.f32.mrb[70].mxu1 }
 0x583   : > { %v6613_v22 = vsel %vm953_vm1, %v8262_v51, 0.0  ;;  %v6019_v14 = vpop.f32.mrb[71].mxu1 }
 0x584   : > { %v6614_v16 = vadd.f32 %v6613_v22, %v6612_v10  ;;  %v6596_v57 = vsel %vm953_vm1, %v6019_v14, 0.0  ;;  %v6679_v14 = vld [vmem:[%s9448_s12 + $0x8] sm:$0xff] }
 0x585   : > { %v6597_v20 = vadd.f32 %v6596_v57, %v6595_v49  ;;  %v6681_v49 = vld [vmem:[%s9448_s12 + $0x18] sm:$0xff]  ;;  %v6678_v57 = vld [vmem:[%s9448_s12] sm:$0xff] }
 0x586   : > { %v8273_v21 = vpop.f32.mrb[58].mxu0 }
 0x587   : > { %v6615_v58 = vsel %vm953_vm1, %v8273_v21, 0.0  ;;  %v6100_v60 = vpop.f32.mrb[59].mxu0 }
 0x588   : > { %v6616_v35 = vadd.f32 %v6615_v58, %v6614_v16  ;;  %v6598_v34 = vsel %vm953_vm1, %v6100_v60, 0.0  ;;  %v8639_v16 = vpack.c.bf16 %v6681_v49, %v6679_v14  ;;  %v6683_v58 = vld [vmem:[%s9448_s12 + $0x28] sm:$0xff]  ;;  %v6685_v60 = vld [vmem:[%s9448_s12 + $0x38] sm:$0xff] }
 0x589   : > { %v6599_v26 = vadd.f32 %v6598_v34, %v6597_v20  ;;  %v6680_v20 = vld [vmem:[%s9448_s12 + $0x10] sm:$0xff]  ;;  %v8643_v34 = vpack.c.bf16 %v6685_v60, %v6683_v58 }
 0x58a   : > { %v8284_v18 = vpop.f32.mrb[72].mxu1  ;;  %v8641_v21 = vpack.c.bf16 %v6680_v20, %v6678_v57  ;;  %8640 = vmatprep.subr.bf16.mxu1 %v8639_v16 }
 0x58b   : > { %v6617_v3 = vsel %vm953_vm1, %v8284_v18, 0.0  ;;  %v6181_v8 = vpop.f32.mrb[73].mxu1 }
 0x58c   : > { %v6618_v52 = vadd.f32 %v6617_v3, %v6616_v35  ;;  %v6600_v43 = vsel %vm953_vm1, %v6181_v8, 0.0  ;;  %8642 = vmatpush1.bf16.msra.mxu1 %v8641_v21  ;;  %v6682_v35 = vld [vmem:[%s9448_s12 + $0x20] sm:$0xff]  ;;  %v6786_v8 = vld [vmem:[%s9463_s16 + $0x8] sm:$0xff] }
 0x58d   : > { %v6601_v24 = vadd.f32 %v6600_v43, %v6599_v26  ;;  %v6684_v26 = vld [vmem:[%s9448_s12 + $0x30] sm:$0xff]  ;;  %8644 = vmatprep.subr.bf16.mxu1 %v8643_v34  ;;  %v6785_v3 = vld [vmem:[%s9463_s16] sm:$0xff]  ;;  %v9091_v43 = vmov 0.0|0.0  }
 0x58e   : > { %v8295_v25 = vpop.f32.mrb[60].mxu0  ;;  %v8645_v18 = vpack.c.bf16 %v6684_v26, %v6682_v35  ;;  %8647 = vmatprep.subr.bf16.mxu0 %v9091_v43 }
 0x58f   : > { %v6619_v45 = vsel %vm953_vm1, %v8295_v25, 0.0  ;;  %v6262_v13 = vpop.f32.mrb[61].mxu0  ;;  %v6788_v25 = vld [vmem:[%s9463_s16 + $0x18] sm:$0xff] }
 0x590   : > { %v6620_v41 = vadd.f32 %v6619_v45, %v6618_v52  ;;  %v6602_v30 = vsel %vm953_vm1, %v6262_v13, 0.0  ;;  %8646 = vmatpush1.bf16.msra.mxu1 %v8645_v18  ;;  %v6787_v52 = vld [vmem:[%s9463_s16 + $0x10] sm:$0xff]  ;;  %v6789_v13 = vld [vmem:[%s9463_s16 + $0x20] sm:$0xff] }
 0x591   : > { %v6603_v23 = vadd.f32 %v6602_v30, %v6601_v24  ;;  %v8648_v24 = vpack.c.bf16 %v6786_v8, %v6785_v3  ;;  %v8651_v45 = vpack.c.bf16 %v6788_v25, %v6787_v52  ;;  %v7456_v52 = vld [vmem:[%s797_s14] ss:$0 sm:$0xff] }
 0x592   : > { %v8306_v37 = vpop.f32.mrb[74].mxu1 }
 0x593   : > { %v6621_v47 = vsel %vm953_vm1, %v8306_v37, 0.0  ;;  %v6343_v38 = vpop.f32.mrb[75].mxu1  ;;  %8649 = vmatpush1.bf16.msra.mxu0 %v8648_v24  ;;  %v6792_v37 = vld [vmem:[%s9463_s16 + $0x38] sm:$0xff] }
 0x594   : > { %v6622_v48 = vadd.f32 %v6621_v47, %v6620_v41  ;;  %v6604_v28 = vsel %vm953_vm1, %v6343_v38, 0.0  ;;  %8650 = vmatprep.subr.bf16.mxu0 %v9091_v43  ;;  %v6790_v41 = vld [vmem:[%s9463_s16 + $0x28] sm:$0xff]  ;;  %v6793_v38 = vld [vmem:[%s9463_s16 + $0x40] sm:$0xff] }
 0x595   : > { %v6605_v53 = vadd.f32 %v6604_v28, %v6603_v23  ;;  %v8654_v30 = vpack.c.bf16 %v6790_v41, %v6789_v13  ;;  %v6791_v23 = vld [vmem:[%s9463_s16 + $0x30] sm:$0xff] }
 0x596   : > { %v8317_v29 = vpop.f32.mrb[62].mxu0  ;;  %v8657_v47 = vpack.c.bf16 %v6792_v37, %v6791_v23 }
 0x597   : > { %v6623_v44 = vsel %vm953_vm1, %v8317_v29, 0.0  ;;  %v6424_v7 = vpop.f32.mrb[63].mxu0  ;;  %8652 = vmatpush1.bf16.msra.mxu0 %v8651_v45  ;;  %v6796_v29 = vld [vmem:[%s9463_s16 + $0x58] sm:$0xff] }
 0x598   : > { %v6624_v32 = vadd.f32 %v6623_v44, %v6622_v48  ;;  %v6606_v27 = vsel %vm953_vm1, %v6424_v7, 0.0  ;;  %8653 = vmatprep.subr.bf16.mxu0 %v9091_v43  ;;  %v6794_v48 = vld [vmem:[%s9463_s16 + $0x48] sm:$0xff]  ;;  %v6797_v7 = vld [vmem:[%s9463_s16 + $0x60] sm:$0xff] }
 0x599   : > { %v6607_v56 = vadd.f32 %v6606_v27, %v6605_v53  ;;  %v8660_v28 = vpack.c.bf16 %v6794_v48, %v6793_v38  ;;  %v6795_v53 = vld [vmem:[%s9463_s16 + $0x50] sm:$0xff] }
 0x59a   : > { %v8328_v50 = vpop.f32.mrb[76].mxu1  ;;  %v8663_v44 = vpack.c.bf16 %v6796_v29, %v6795_v53 }
 0x59b   : > { %v6625_v19 = vsel %vm953_vm1, %v8328_v50, 0.0  ;;  %v6505_v63 = vpop.f32.mrb[77].mxu1  ;;  %8655 = vmatpush1.bf16.msra.mxu0 %v8654_v30  ;;  %v6800_v50 = vld [vmem:[%s9463_s16 + $0x78] sm:$0xff] }
 0x59c   : > { %v6626_v62 = vadd.f32 %v6625_v19, %v6624_v32  ;;  %v6608_v55 = vsel %vm953_vm1, %v6505_v63, 0.0  ;;  %8656 = vmatprep.subr.bf16.mxu0 %v9091_v43  ;;  %v6798_v32 = vld [vmem:[%s9463_s16 + $0x68] sm:$0xff] }
 0x59d   : > { %v6609_v31 = vadd.f32 %v6608_v55, %v6607_v56  ;;  %v8666_v27 = vpack.c.bf16 %v6798_v32, %v6797_v7  ;;  %v6799_v56 = vld [vmem:[%s9463_s16 + $0x70] sm:$0xff] }
 0x59e   : > { %v8339_v54 = vpop.f32.mrb[64].mxu0  ;;  %v8669_v19 = vpack.c.bf16 %v6800_v50, %v6799_v56 }
 0x59f   : > { %v6627_v59 = vsel %vm953_vm1, %v8339_v54, 0.0  ;;  %v6586_v61 = vpop.f32.mrb[65].mxu0  ;;  %8658 = vmatpush1.bf16.msra.mxu0 %v8657_v47 }
 0x5a0   : > { %v6628_v0 = vadd.f32 %v6627_v59, %v6626_v62  ;;  %v6610_v5 = vsel %vm953_vm1, %v6586_v61, 0.0  ;;  %8659 = vmatprep.subr.bf16.mxu0 %v9091_v43 }
 0x5a1   : > { %v6611_v4 = vadd.f32 %v6610_v5, %v6609_v31  ;;  %v7452_v5 = vld [vmem:[%s10421_s11] ss:$0 sm:$0xff] }
 0x5a2   : > { %v6634_v33 = vadd.f32 %v8849_v1, %v6628_v0 }
 0x5a3   : > { %v6633_v6 = vadd.f32 %v8850_v36, %v6611_v4  ;;  %8661 = vmatpush1.bf16.msra.mxu0 %v8660_v28 }
 0x5a4   : > { %v6638_v2 = vsel %vm953_vm1, %v6634_v33, 0.0  ;;  %8662 = vmatprep.subr.bf16.mxu0 %v9091_v43 }
 0x5a5   : > { %6639 = vadd.xlane.f32.xlu1 %v6638_v2  ;;  %v6635_v17 = vsel %vm953_vm1, %v6633_v6, 0.0 }
 0x5a6   : > { %6636 = vadd.xlane.f32.xlu0 %v6635_v17 }
 0x5a7   : > { %8664 = vmatpush1.bf16.msra.mxu0 %v8663_v44 }
 0x5a8   : > { %8665 = vmatprep.subr.bf16.mxu0 %v9091_v43 }
 0x5ab   : > { %8667 = vmatpush1.bf16.msra.mxu0 %v8666_v27 }
 0x5ac   : > { %8668 = vmatprep.subr.bf16.mxu0 %v9091_v43 }
 0x5af   : > { %8670 = vmatpush1.bf16.msra.mxu0 %v8669_v19 }
 0x5b0   : > { %8671 = vmatprep.subr.bf16.mxu0 %v9091_v43 }
 0x632   : > { %v6640_v40 = vpop.xlane.xlu1 %6639 }
 0x633   : > { %v6643_v46 = vmul.f32 0.03125, %v6640_v40  ;;  %v6637_v39 = vpop.xlane.xlu0 %6636  ;;  %v6801_v40 = vld [vmem:[%s9463_s16 + $0x80] sm:$0xff] }
 0x634   : > { %v6642_v15 = vmul.f32 0.03125, %v6637_v39 }
 0x635   : > { %v10184_v12 = vsub.f32 %v6634_v33, %v6643_v46  ;;  %v7453_v33 = vld [vmem:[%s10422_s22] ss:$0 sm:$0xff]  ;;  %v6802_v46 = vld [vmem:[%s9463_s16 + $0x88] sm:$0xff]  ;;  %s10428_s22 = sld [smem:[#allocation30_spill]] (!%p7461_p5) }
 0x636   : > { %v10186_v11 = vsub.f32 %v6633_v6, %v6642_v15  ;;  %v8672_v39 = vpack.c.bf16 %v6802_v46, %v6801_v40  ;;  %v6803_v15 = vld [vmem:[%s9463_s16 + $0x90] sm:$0xff]  ;;  %v9092_v46 = vmov (!%p7461_p5), 0.0|0.0  }
 0x637   : > { %v6647_v9 = vmul.f32 %v10184_v12, %v10184_v12  ;;  %v6959_v40 = vld [vmem:[%s10427_s1 + $0x10] sm:$0xff] (!%p7461_p5) }
 0x638   : > { %v6646_v51 = vmul.f32 %v10186_v11, %v10186_v11  ;;  %8673 = vmatpush1.bf16.msra.mxu0 %v8672_v39 }
 0x639   : > { %v6651_v10 = vsel %vm953_vm1, %v6647_v9, 0.0  ;;  %8674 = vmatprep.subr.bf16.mxu0 %v9091_v43  ;;  %v6688_v9 = vlaneseq }
 0x63a   : > { %6652 = vadd.xlane.f32.xlu1 %v6651_v10  ;;  %v6648_v22 = vsel %vm953_vm1, %v6646_v51, 0.0 }
 0x63b   : > { %6649 = vadd.xlane.f32.xlu0 %v6648_v22  ;;  %v6689_v51 = vshrl.u32 %v6688_v9, 7  ;;  %v6686_v22 = vld [vmem:[%s9453_s23] sm:$0x3]  ;;  %s10424_s23 = scalar_lea.vmem %s10364_s7, %s9425_s30 }
 0x63d   : > { %v6690_v10 = vsub.s32 0, %v6689_v51  ;;  %v6694_v14 = vsub.s32 1, %v6689_v51 }
 0x63f   : > { %v6691_v49 = vrot.slane %v6686_v22, %v6690_v10 }
 0x6c7   : > { %v6653_v63 = vpop.xlane.xlu1 %6652 }
 0x6c8   : > { %v6655_v62 = vmul.f32 0.03125, %v6653_v63  ;;  %v6650_v55 = vpop.xlane.xlu0 %6649 }
 0x6c9   : > { %v6654_v31 = vmul.f32 0.03125, %v6650_v55 }
 0x6ca   : > { %v6657_v54 = vadd.f32 1e-05, %v6655_v62 }
 0x6cb   : > { %v6656_v59 = vadd.f32 1e-05, %v6654_v31 }
 0x6cc   : > { %8841 = vrsqrt.f32 %v6657_v54 }
 0x6cd   : > { %8843 = vrsqrt.f32 %v6656_v59  ;;  %v7459_v59 = vld [vmem:[%s10424_s23] ss:$0 sm:$0xff] }
 0x6d6   : > { %v8842_v61 = vpop.eup %8841 }
 0x6d7   : > { %v8844_v0 = vpop.eup %8843  ;;  %v6661_v1 = vmul.f32 %v8842_v61, %v10184_v12  ;;  %v6804_v12 = vld [vmem:[%s9463_s16 + $0x98] sm:$0xff] }
 0x6d8   : > { %v6660_v4 = vmul.f32 %v8844_v0, %v10186_v11  ;;  %v8675_v11 = vpack.c.bf16 %v6804_v12, %v6803_v15  ;;  %v7460_v0 = vld [vmem:[%s10425_s20] ss:$0 sm:$0xff]  ;;  %v6960_v15 = vld [vmem:[%s10427_s1 + $0x18] sm:$0xff] (!%p7461_p5)  ;;  %v9094_v12 = vmov (!%p7461_p5), 0.0  }
 0x6d9   : > { %v6669_v2 = vmul.f32 %v7452_v5, %v6661_v1 }
 0x6da   : > { %v6668_v36 = vmul.f32 %v7452_v5, %v6660_v4  ;;  %8676 = vmatpush1.bf16.msra.mxu0 %v8675_v11 }
 0x6db   : > { %v6677_v17 = vadd.f32 %v7453_v33, %v6669_v2  ;;  %v6957_v2 = vld [vmem:[%s10426_s24] sm:$0xff] (!%p7461_p5)  ;;  %8677 = vmatprep.subr.bf16.mxu0 (!%p7461_p5), %v9092_v46 }
 0x6dc   : > { %v6676_v6 = vadd.f32 %v7453_v33, %v6668_v36 }
 0x6de   : > { %7454 = vmatmul.mubr.msk.f32.vlgmr.msra.gmra.mrb[78].mxu1 %vm953_vm1, %v6676_v6 }
 0x6df   : > { %6774 = vmatprep.mubr.f32.mxu1 %v9089_v42  ;;  %v6695_v42 = vrot.slane %v6686_v22, %v6694_v14  ;;  %v8681_v22 = vpack.c.bf16 (!%p7461_p5), %v6960_v15, %v6959_v40 }
 0x6e2   : > { %7455 = vmatmul.mubr.msk.f32.gmra.mrb[80].mxu1 %vm953_vm1, %v6677_v17 }
 0x7b1   : > { %v6770_v16 = vpop.f32.mrb[78].mxu1 }
 0x7b2   : > { %v6771_v57 = vadd.f32 %v6770_v16, %v6691_v49  ;;  %v6772_v20 = vpop.f32.mrb[79].mxu1 }
 0x7b3   : > { %v6773_v21 = vadd.f32 %v6772_v20, %v6695_v42 }
 0x7b4   : > { %v6781_v35 = vmax.f32 %v6771_v57, 0.0 }
 0x7b5   : > { %v6782_v58 = vmax.f32 %v6773_v21, 0.0  ;;  %v6776_v60 = vpop.f32.mrb[80].mxu1 }
 0x7b6   : > { %v6777_v34 = vadd.f32 %v6776_v60, %v6691_v49  ;;  %v6778_v26 = vpop.f32.mrb[81].mxu1 }
 0x7b7   : > { %v6779_v18 = vadd.f32 %v6778_v26, %v6695_v42  ;;  %7457 = vmatprep.mubr.msk.f32.mxu0 %vm953_vm1, %v6782_v58  ;;  %v7462_v26 = vld [vmem:[%s10428_s22] ss:$0 sm:$0xff] (!%p7461_p5) }
 0x7b8   : > { %6883 = vmatmul.mubr.f32.vlgmr.msra.gmra.mrb[66].mxu0 %v6781_v35  ;;  %v6783_v8 = vmax.f32 %v6777_v34, 0.0 }
 0x7b9   : > { %v6784_v3 = vmax.f32 %v6779_v18, 0.0 }
 0x7bb   : > { %7458 = vmatprep.mubr.msk.f32.mxu0 %vm953_vm1, %v6784_v3 }
 0x7bc   : > { %6888 = vmatmul.mubr.f32.gmra.mrb[68].mxu0 %v6783_v8 }
 0x7bd   : > { %8348 = vmatprep.mubr.msk.f32.mxu0 (!%p7461_p5), %vm9093_vm4, %v9094_v12 }
 0x88b   : > { %v6884_v43 = vpop.f32.mrb[66].mxu0 }
 0x88c   : > { %v6885_v24 = vadd.f32 %v7456_v52, %v6884_v43  ;;  %v6886_v25 = vpop.f32.mrb[67].mxu0 }
 0x88e   : > { %v6893_v45 = vadd.f32 %v6885_v24, %v6676_v6 }
 0x88f   : > { %v6889_v13 = vpop.f32.mrb[68].mxu0 }
 0x890   : > { %v6890_v41 = vadd.f32 %v7456_v52, %v6889_v13  ;;  %v6891_v30 = vpop.f32.mrb[69].mxu0  ;;  %v6895_v23 = vsel %vm953_vm1, %v6893_v45, 0.0 }
 0x891   : > { %6896 = vadd.xlane.f32.xlu0 %v6895_v23  ;;  %v7069_v23 = vld [vmem:[%s10429_s10] sm:$0x3] (!%p7461_p5) }
 0x892   : > { %v6894_v37 = vadd.f32 %v6890_v41, %v6677_v17  ;;  %v6958_v17 = vld [vmem:[%s10427_s1 + $0x8] sm:$0xff] (!%p7461_p5) }
 0x893   : > { %v8678_v39 = vpack.c.bf16 (!%p7461_p5), %v6958_v17, %v6957_v2 }
 0x894   : > { %v6898_v47 = vsel %vm953_vm1, %v6894_v37, 0.0 }
 0x895   : > { %6899 = vadd.xlane.f32.xlu1 %v6898_v47  ;;  %8679 = vmatpush3.bf16.msra.mxu0 (!%p7461_p5), %v8678_v39 }
 0x896   : > { %8680 = vmatprep.subr.bf16.mxu0 (!%p7461_p5), %v9092_v46 }
 0x899   : > { %8682 = vmatpush3.bf16.msra.mxu0 (!%p7461_p5), %v8681_v22 }
 0x91e   : > { %v6897_v38 = vpop.xlane.xlu0 %6896 }
 0x91f   : > { %v6901_v48 = vmul.f32 0.03125, %v6897_v38 }
 0x921   : > { %v6903_v28 = vsub.f32 %v6893_v45, %v6901_v48 }
 0x922   : > { %v6900_v53 = vpop.xlane.xlu1 %6899 }
 0x923   : > { %v6902_v29 = vmul.f32 0.03125, %v6900_v53  ;;  %v6905_v44 = vmul.f32 %v6903_v28, %v6903_v28 }
 0x925   : > { %v6904_v7 = vsub.f32 %v6894_v37, %v6902_v29  ;;  %v6907_v32 = vsel %vm953_vm1, %v6905_v44, 0.0 }
 0x926   : > { %6908 = vadd.xlane.f32.xlu0 %v6907_v32 }
 0x927   : > { %v6906_v27 = vmul.f32 %v6904_v7, %v6904_v7 }
 0x929   : > { %v6910_v56 = vsel %vm953_vm1, %v6906_v27, 0.0 }
 0x92a   : > { %6911 = vadd.xlane.f32.xlu1 %v6910_v56 }
 0x9b3   : > { %v6909_v50 = vpop.xlane.xlu0 %6908 }
 0x9b4   : > { %v6913_v19 = vmul.f32 0.03125, %v6909_v50 }
 0x9b6   : > { %v6915_v63 = vadd.f32 1e-05, %v6913_v19 }
 0x9b7   : > { %v6912_v62 = vpop.xlane.xlu1 %6911 }
 0x9b8   : > { %8845 = vrsqrt.f32 %v6915_v63  ;;  %v6914_v55 = vmul.f32 0.03125, %v6912_v62 }
 0x9ba   : > { %v6916_v31 = vadd.f32 1e-05, %v6914_v55 }
 0x9bc   : > { %8847 = vrsqrt.f32 %v6916_v31 }
 0x9c2   : > { %v8846_v54 = vpop.eup %8845 }
 0x9c3   : > { %v6919_v61 = vmul.f32 %v8846_v54, %v6903_v28 }
 0x9c5   : > { %v6927_v5 = vmul.f32 %v7459_v59, %v6919_v61 }
 0x9c6   : > { %v8848_v4 = vpop.eup %8847 }
 0x9c7   : > { %v6935_v1 = vadd.f32 %v7460_v0, %v6927_v5  ;;  %v6920_v33 = vmul.f32 %v8848_v4, %v6904_v7  ;;  %6942 = sbr.rel (%p7461_p5) target bundleno = 3385 (0xd39), region = 108 }
 0x9c9   : > { %6937 = vst.msk [vmem:[#allocation2] sm:$0xff] %vm953_vm1, %v6935_v1  ;;  %v6928_v36 = vmul.f32 %v7459_v59, %v6920_v33  ;;  %v6943_v11 = vsel (!%p7461_p5), %vm953_vm1, %v6935_v1, -inf }
 0x9ca   : > { %v6944_v51 = vrot.slane (!%p7461_p5), %v6943_v11, 4 }
 0x9cb   : > { %v6936_v6 = vadd.f32 %v7460_v0, %v6928_v36 }
 0x9cc   : > { %v6945_v14 = vmax.f32 (!%p7461_p5), %v6943_v11, %v6944_v51 }
 0x9cd   : > { %6938 = vst.msk [vmem:[#allocation2 + $0x8] sm:$0xff] %vm953_vm1, %v6936_v6  ;;  %v6950_v9 = vsel (!%p7461_p5), %vm953_vm1, %v6936_v6, -inf }
 0x9ce   : > { %v6951_v10 = vrot.slane %v6950_v9, 4  ;;  %v6946_v42 = vrot.slane %v6945_v14, 2 }
 0x9d0   : > { %v6952_v49 = vmax.f32 %v6950_v9, %v6951_v10  ;;  %v6947_v57 = vmax.f32 %v6945_v14, %v6946_v42 }
 0x9d2   : > { %v6953_v16 = vrot.slane %v6952_v49, 2  ;;  %v6948_v21 = vrot.slane %v6947_v57, 1 }
 0x9d4   : > { %v6954_v20 = vmax.f32 %v6952_v49, %v6953_v16  ;;  %v6949_v60 = vmax.f32 %v6947_v57, %v6948_v21 }
 0x9d6   : > { %v6955_v58 = vrot.slane %v6954_v20, 1 }
 0x9d8   : > { %v6956_v35 = vmax.f32 %v6954_v20, %v6955_v58 }
 0x9da   : > { %v6971_v34 = vsel %vm6970_vm5, %v6956_v35, %v6949_v60 }
 0x9db   : > { %8349 = vmatmul.mubr.msk.f32.vlgmr.msra.gmra.mrb[0].mxu0 %vm953_vm1, %v6971_v34 }
 0xaae   : > { %v7040_v18 = vpop.f32.mrb[0].mxu0 }
 0xaaf   : > { %v7041_v3 = vadd.f32 %v7462_v26, %v7040_v18  ;;  %v8350_v8 = vpop.f32.mrb[1].mxu0 }
 0xab1   : > { %v7045_v52 = vsel %vm7044_vm6, %v7041_v3, -inf }
 0xab2   : > { %7046 = vmax.xlane.f32.xlu0 %v7045_v52 }
 0xb3f   : > { %v7047_v43 = vpop.xlane.xlu0 %7046 }
 0xb40   : > { %v7048_v24 = vsub.f32 %v7041_v3, %v7047_v43 }
 0xb42   : > { %v7049_v25 = vmul.f32 1.442695, %v7048_v24 }
 0xb44   : > { %8851 = vpow2.f32 %v7049_v25 }
 0xb4e   : > { %v8852_v45 = vpop.eup %8851 }
 0xb4f   : > { %v7051_v13 = vsel %vm7044_vm6, %v8852_v45, 0.0 }
 0xb50   : > { %7052 = vadd.xlane.f32.xlu0 %v7051_v13 }
 0xbdd   : > { %v7053_v41 = vpop.xlane.xlu0 %7052 }
 0xbde   : > { %8853 = vrcp.f32 %v7053_v41 }
 0xbe8   : > { %v8854_v30 = vpop.eup %8853 }
 0xbe9   : > { %v7055_v37 = vmul.f32 %v8854_v30, %v8852_v45 }
 0xbeb   : > { %v7057_v47 = vsel %vm7044_vm6, %v7055_v37, -inf  ;;  %7056 = vst.msk [vmem:[#allocation11] sm:$0x3] %vm7044_vm6, %v7055_v37  ;;  %v7070_v38 = vmul.f32 %v7069_v23, %v7055_v37 }
 0xbec   : > { %7058 = vmax.xlane.f32.xlu1 %v7057_v47 }
 0xbed   : > { %v7071_v48 = vsel %vm7044_vm6, %v7070_v38, 0.0 }
 0xbee   : > { %7072 = vadd.xlane.f32.xlu0 %v7071_v48 }
 0xc79   : > { %v7059_v28 = vpop.xlane.xlu1 %7058 }
 0xc7a   : > { %v7060_v53 = vsub.f32 %v7055_v37, %v7059_v28 }
 0xc7b   : > { %v7073_v19 = vpop.xlane.xlu0 %7072 }
 0xc7c   : > { %v7061_v29 = vmul.f32 1.442695, %v7060_v53 }
 0xc7e   : > { %8855 = vpow2.f32 %v7061_v29 }
 0xc88   : > { %v8856_v44 = vpop.eup %8855 }
 0xc89   : > { %v7063_v7 = vsel %vm7044_vm6, %v8856_v44, 0.0 }
 0xc8a   : > { %7064 = vadd.xlane.f32.xlu1 %v7063_v7 }
 0xd17   : > { %v7065_v32 = vpop.xlane.xlu1 %7064 }
 0xd18   : > { %8857 = vlog2.f32 %v7065_v32 }
 0xd22   : > { %v8858_v27 = vpop.eup %8857 }
 0xd23   : > { %v7067_v56 = vmul.f32 0.6931472, %v8858_v27 }
 0xd25   : > { %v7068_v50 = vadd.f32 %v7067_v56, %v7059_v28 }
 0xd27   : > { %v7074_v63 = vsub.f32 %v7068_v50, %v7073_v19 }
 0xd29   : > { %v7076_v62 = vsel %vm7075_vm7, %v7074_v63, 0.0 }
 0xd2a   : > { %v7077_v55 = vrot.slane %v7076_v62, 4 }
 0xd2c   : > { %v7078_v31 = vadd.f32 %v7077_v55, %v7076_v62 }
 0xd2e   : > { %v7079_v54 = vrot.slane %v7078_v31, 2 }
 0xd30   : > { %v7080_v59 = vadd.f32 %v7079_v54, %v7078_v31 }
 0xd32   : > { %v7081_v61 = vrot.slane %v7080_v59, 1 }
 0xd34   : > { %v7082_v0 = vadd.f32 %v7081_v61, %v7080_v59 }
 0xd36   : > { %v7084_v5 = vmul.f32 0.5, %v7082_v0 }
 0xd38   : > { %7086 = vst.msk [vmem:[#allocation12] sm:$0x1] %vm7085_vm8, %v7084_v5 }
 0xd39 PF: > { %p8723_p6 = scmp.eq.s32.totalorder %s9206_s28, 1  ;;  %s9095_s14 = smov [#allocation11]  }
 0xd3a   : > { %s7094_s29 = sshll.u32 %s9095_s14, 4  ;;  %s9096_s23 = smov [#allocation12]   ;;  %s7095_s29 = int_to_ptr.vmem [resolvable:$true] %s7094_s29 }
 0xd3b   : > { %s7105_s19 = sshll.u32 %s9096_s23, 4  ;;  %s8979_s15 = scalar_lea.vmem %s7095_s29, 32  ;;  %s7106_s19 = int_to_ptr.vmem [resolvable:$true] %s7105_s19 }
 0xd3c   : > { %p8980_p10 = scmp.ne.s32.totalorder %s7095_s29, %s8979_s15  ;;  %p8986_p1 = scmp.lt.s32.totalorder %s7095_s29, %s7095_s29 }
 0xd3d   : > { %p8987_p11 = scmp.lt.s32.totalorder %s8979_s15, %s8979_s15 }
 0xd3e   : > { %p8981_p4 = pnand %p8980_p10, %p8723_p6 }
 0xd3f   : > { %p8988_p2 = por %p8987_p11, %p8986_p1 }
 0xd40   : > { %p8982_p13 = pneg %p8981_p4 }
 0xd42   : > { %p8989_p9 = pnand %p8988_p2, %p8982_p13 }
 0xd44   : > { %8992 = shalt.err (!%p8989_p9)
}
 0xd45   : > { %s10430_s17 = sld [smem:[#allocation32_spill]] }
 0xd4b   : > { %s8993_s24 = scalar_lea.hbm %s10430_s17, 32 }
 0xd4c   : > { %p8994_p0 = scmp.ne.s32.totalorder %s10430_s17, %s8993_s24  ;;  %p8999_p8 = scmp.lt.u32.totalorder %s8993_s24, %s10430_s17 }
 0xd4e   : > { %p8995_p12 = pnand %p8994_p0, %p8723_p6 }
 0xd50   : > { %p8996_p7 = pneg %p8995_p12 }
 0xd52   : > { %p9001_p3 = pnand %p8999_p8, %p8996_p7 }
 0xd54   : > { %9004 = shalt.err (!%p9001_p3)
}
 0xd55   : > { %8702 = dma.vmem_to_hbm [thread:$0]  (%p8723_p6), %s7095_s29, 32, %s10430_s17, [#allocation5]  }
 0xd56   : > { %s9005_s18 = scalar_lea.vmem %s7106_s19, 16  ;;  %s9011_s2 = scalar_lea.vmem %s7106_s19, 32 }
 0xd57   : > { %p9006_p5 = scmp.ne.s32.totalorder %s7106_s19, %s9005_s18  ;;  %p9012_p13 = scmp.lt.s32.totalorder %s7106_s19, %s7106_s19 }
 0xd58   : > { %p9013_p1 = scmp.lt.s32.totalorder %s9011_s2, %s9005_s18 }
 0xd59   : > { %p9007_p10 = pnand %p9006_p5, %p8723_p6 }
 0xd5a   : > { %p9014_p11 = por %p9013_p1, %p9012_p13 }
 0xd5b   : > { %p9008_p4 = pneg %p9007_p10 }
 0xd5d   : > { %p9015_p2 = pnand %p9014_p11, %p9008_p4 }
 0xd5f   : > { %9018 = shalt.err (!%p9015_p2)
}
 0xd60   : > { %s10431_s12 = sld [smem:[#allocation33_spill]] }
 0xd66   : > { %s9019_s10 = scalar_lea.hbm %s10431_s12, 16 }
 0xd67   : > { %p9020_p9 = scmp.ne.s32.totalorder %s10431_s12, %s9019_s10  ;;  %p9025_p7 = scmp.lt.u32.totalorder %s9019_s10, %s10431_s12 }
 0xd69   : > { %p9021_p0 = pnand %p9020_p9, %p8723_p6 }
 0xd6b   : > { %p9022_p12 = pneg %p9021_p0 }
 0xd6d   : > { %p9027_p8 = pnand %p9025_p7, %p9022_p12 }
 0xd6f   : > { %9030 = shalt.err (!%p9027_p8)
}
 0xd70   : > { %8704 = dma.vmem_to_hbm [thread:$0]  (%p8723_p6), %s7106_s19, 16, %s10431_s12, [#allocation13]  }
 0xd71   : > { %9060 = dma.done.wait (%p8723_p6), [#allocation5], 32  }
 0xd72   : > { %9062 = vsyncadd (%p8723_p6), [#allocation5], 4294967264 }
 0xd73   : > { %9064 = dma.done.wait (%p8723_p6), [#allocation13], 16  }
 0xd74   : > { %9066 = vsyncadd (%p8723_p6), [#allocation13], 4294967280 }
 0xd75 PF: > { %s10432_s27 = sld [smem:[#allocation20_spill]]  ;;  %s10433_s30 = sld [smem:[#allocation19_spill]] }
 0xd76   : > { %s10434_s26 = sld [smem:[#allocation21_spill]]  ;;  %s10435_s24 = smov %s9073_s25 }
 0xd7b   : > { %p36_p3 = scmp.ge.s32.totalorder %s10432_s27, 4   ;;  %s10436_s25 = smov %s10433_s30 }
 0xd7d   :  { %38 = sbr.rel (!%p36_p3) target bundleno = 22 (0x16), region = 198 }
 0xd84   :  { %7122 = vsyncpa [#allocation4], 1 }
 0xd85   :  { %7124 = vsyncpa [#allocation4 + $0x1], 1 }
 0xd86   :  { %7125 = vsyncpa [#allocation7], 1 }
 0xd87   :  { %7127 = vsyncpa [#allocation7 + $0x1], 1 }
 0xd88   :  { %7128 = vsyncpa [#allocation10], 1 }
 0xd89   :  { %7130 = vsyncpa [#allocation10 + $0x1], 1 }
 0xd8a   :  { %7131 = vsyncpa [#allocation5], 1 }
 0xd8b   :  { %7133 = vsyncpa [#allocation5 + $0x1], 1 }
 0xd8c   :  { %7134 = vsyncpa [#allocation13], 1 }

</bundles_post_ra>
